<compile_context>
chip_gen: v5e
topology: v5e:2x2
jax: 0.10.0
libtpu: 0.0.40
codegen_flags: <defaults>
</compile_context>

<pallas_src>
import jax
import jax.numpy as jnp
import numpy as np
from jax import lax
from jax.experimental import pallas as pl
from jax.experimental.pallas import tpu as pltpu

N_HEADS = 4
LN_EPS = 1e-5


def _make_encoder_kernel(n_heads, return_attn):
    def kernel(x_ref,
               wqkv_ref, bqkv_ref,
               wo_ref, bo_ref,
               ln1w_ref, ln1b_ref,
               w1_ref, b1_ref, w2_ref, b2_ref,
               ln2w_ref, ln2b_ref,
               out_ref, *maybe_attn):
        attn_ref = maybe_attn[0] if return_attn else None

        # One batch element per grid step.
        x = x_ref[...].astype(jnp.float32)            # [L, D] fp32 (residual path)
        L, D = x.shape
        dh = D // n_heads

        # --- fused Q/K/V projection: one bf16 MXU pass, 3x wide N ---------
        # (1/sqrt(dh) is already folded into the Q columns host-side.)
        qkv = jnp.dot(x.astype(jnp.bfloat16), wqkv_ref[...],
                      preferred_element_type=jnp.float32) + bqkv_ref[...]
        q = qkv[:, 0 * D:1 * D]
        k = qkv[:, 1 * D:2 * D]
        v = qkv[:, 2 * D:3 * D]

        # --- multi-head attention, accumulating the output projection -----
        acc = jnp.zeros((L, D), jnp.float32)
        for h in range(n_heads):
            lo, hi = h * dh, (h + 1) * dh
            qh = q[:, lo:hi].astype(jnp.bfloat16)
            kh = k[:, lo:hi].astype(jnp.bfloat16)
            vh = v[:, lo:hi].astype(jnp.bfloat16)

            # scores: contract last dims directly (no materialized transpose)
            s = lax.dot_general(qh, kh, (((1,), (1,)), ((), ())),
                                preferred_element_type=jnp.float32)
            s = s - jnp.max(s, axis=-1, keepdims=True)
            e = jnp.exp(s)
            # exact reciprocal (EUP path, off the VALU slot); probs sum to ~1
            p = e * pl.reciprocal(jnp.sum(e, axis=-1, keepdims=True),
                                  approx=False)

            if return_attn:
                # per-head store straight into the output block (no stack)
                attn_ref[h, :, :] = p.astype(attn_ref.dtype)

            ctx = jnp.dot(p.astype(jnp.bfloat16), vh,
                          preferred_element_type=jnp.float32)       # [L, dh]
            # fold the output projection per head: sum_h ctx_h @ wo[h-rows]
            acc = acc + jnp.dot(ctx.astype(jnp.bfloat16), wo_ref[lo:hi, :],
                                preferred_element_type=jnp.float32)

        new_x = acc + bo_ref[...]

        # --- residual + LayerNorm1 (dropout == identity, fp32 math) -------
        x1 = x + new_x
        mu = jnp.mean(x1, axis=-1, keepdims=True)
        var = jnp.mean((x1 - mu) ** 2, axis=-1, keepdims=True)
        xn = (x1 - mu) * lax.rsqrt(var + LN_EPS) * ln1w_ref[...] + ln1b_ref[...]

        # --- FFN: conv1(k=1) -> relu -> conv2(k=1) (pointwise, bf16 MXU) --
        h1 = jnp.dot(xn.astype(jnp.bfloat16), w1_ref[...],
                     preferred_element_type=jnp.float32) + b1_ref[...]
        h1 = jnp.maximum(h1, 0.0)
        y = jnp.dot(h1.astype(jnp.bfloat16), w2_ref[...],
                    preferred_element_type=jnp.float32) + b2_ref[...]

        # --- residual + LayerNorm2 -----------------------------------------
        z = xn + y
        mu2 = jnp.mean(z, axis=-1, keepdims=True)
        var2 = jnp.mean((z - mu2) ** 2, axis=-1, keepdims=True)
        out = (z - mu2) * lax.rsqrt(var2 + LN_EPS) * ln2w_ref[...] + ln2b_ref[...]

        out_ref[...] = out.astype(out_ref.dtype)

    return kernel


def _vmem_limit_bytes():
    """Per-generation VMEM budget (<= ~85% of physical), with safe fallback."""
    try:
        cap = pltpu.get_tpu_info().vmem_capacity_bytes
        return min(int(cap * 0.85), 100 * 1024 * 1024)
    except Exception:
        return 32 * 1024 * 1024


def prepare_encoder_params(params, n_heads=N_HEADS):
    """One-time host-side fusion: fold the Q scale, fuse wqkv/bqkv, cast
    matmul weights to bf16 (biases / LN params stay fp32)."""
    d_model = params["wq"].shape[0]
    dh = d_model // n_heads
    scale = jnp.float32(1.0 / np.sqrt(dh))
    wqkv = jnp.concatenate(
        [params["wq"] * scale, params["wk"], params["wv"]], axis=1)
    bqkv = jnp.concatenate(
        [params["bq"] * scale, params["bk"], params["bv"]], axis=1)
    return {
        "wqkv": wqkv.astype(jnp.bfloat16),
        "bqkv": bqkv.astype(jnp.float32),
        "wo": params["wo"].astype(jnp.bfloat16),
        "bo": params["bo"].astype(jnp.float32),
        "ln1w": params["ln1w"].astype(jnp.float32),
        "ln1b": params["ln1b"].astype(jnp.float32),
        "w1": params["w1"].astype(jnp.bfloat16),
        "b1": params["b1"].astype(jnp.float32),
        "w2": params["w2"].astype(jnp.bfloat16),
        "b2": params["b2"].astype(jnp.float32),
        "ln2w": params["ln2w"].astype(jnp.float32),
        "ln2b": params["ln2b"].astype(jnp.float32),
    }


def encoder_layer(x, fused_params, *, n_heads=N_HEADS, return_attn=True,
                  single_buffer_weights=True):
    """x: [B, L, D] float32.  Returns out [B, L, D] (and attn [B, H, L, L])."""
    B, L, D = x.shape
    H = n_heads

    fp = fused_params
    param_arrays = [
        fp["wqkv"], fp["bqkv"],
        fp["wo"], fp["bo"],
        fp["ln1w"], fp["ln1b"],
        fp["w1"], fp["b1"], fp["w2"], fp["b2"],
        fp["ln2w"], fp["ln2b"],
    ]

    def weight_spec(arr):
        n = arr.ndim
        idx = lambda b, n=n: (0,) * n
        if single_buffer_weights:
            # constant across the grid -> single-buffer to halve weight VMEM
            return pl.BlockSpec(arr.shape, idx, pipeline_mode=pl.Buffered(1))
        return pl.BlockSpec(arr.shape, idx)

    in_specs = [pl.BlockSpec((None, L, D), lambda b: (b, 0, 0))]
    in_specs += [weight_spec(p) for p in param_arrays]

    out_specs = [pl.BlockSpec((None, L, D), lambda b: (b, 0, 0))]
    out_shape = [jax.ShapeDtypeStruct((B, L, D), jnp.float32)]
    if return_attn:
        out_specs.append(pl.BlockSpec((None, H, L, L), lambda b: (b, 0, 0, 0)))
        out_shape.append(jax.ShapeDtypeStruct((B, H, L, L), jnp.float32))

    grid_spec = pltpu.PrefetchScalarGridSpec(
        num_scalar_prefetch=0,
        grid=(B,),
        in_specs=in_specs,
        out_specs=tuple(out_specs),
    )

    kernel = _make_encoder_kernel(n_heads, return_attn)

    results = pl.pallas_call(
        kernel,
        grid_spec=grid_spec,
        out_shape=tuple(out_shape),
        compiler_params=pltpu.CompilerParams(
            dimension_semantics=("parallel",),   # shards batch over TCs (v7x)
            vmem_limit_bytes=_vmem_limit_bytes(),
        ),
    )(x, *param_arrays)

    if return_attn:
        return results
    return results[0]


def encoder_layer_ref(x, params):
    """Pure-JAX fp32 reference (mirrors the PyTorch forward in eval mode)."""
    B, L, D = x.shape
    H = N_HEADS
    dh = D // H
    q = x @ params["wq"] + params["bq"]
    k = x @ params["wk"] + params["bk"]
    v = x @ params["wv"] + params["bv"]
    q = q.reshape(B, L, H, dh).transpose(0, 2, 1, 3)
    k = k.reshape(B, L, H, dh).transpose(0, 2, 1, 3)
    v = v.reshape(B, L, H, dh).transpose(0, 2, 1, 3)
    s = jnp.einsum("bhqd,bhkd->bhqk", q, k) / jnp.sqrt(jnp.float32(dh))
    p = jax.nn.softmax(s, axis=-1)
    o = jnp.einsum("bhqk,bhkd->bhqd", p, v).transpose(0, 2, 1, 3).reshape(B, L, D)
    new_x = o @ params["wo"] + params["bo"]

    def ln(z, w, b):
        mu = jnp.mean(z, axis=-1, keepdims=True)
        var = jnp.mean((z - mu) ** 2, axis=-1, keepdims=True)
        return (z - mu) * lax.rsqrt(var + LN_EPS) * w + b

    x1 = x + new_x
    xn = ln(x1, params["ln1w"], params["ln1b"])
    h1 = jnp.maximum(xn @ params["w1"] + params["b1"], 0.0)
    y = h1 @ params["w2"] + params["b2"]
    return ln(xn + y, params["ln2w"], params["ln2b"]), p


def init_params(key, d_model, d_ff):
    ks = jax.random.split(key, 8)
    s = 0.02
    return {
        "wq": s * jax.random.normal(ks[0], (d_model, d_model), jnp.float32),
        "bq": jnp.zeros((1, d_model), jnp.float32),
        "wk": s * jax.random.normal(ks[1], (d_model, d_model), jnp.float32),
        "bk": jnp.zeros((1, d_model), jnp.float32),
        "wv": s * jax.random.normal(ks[2], (d_model, d_model), jnp.float32),
        "bv": jnp.zeros((1, d_model), jnp.float32),
        "wo": s * jax.random.normal(ks[3], (d_model, d_model), jnp.float32),
        "bo": s * jax.random.normal(ks[4], (1, d_model), jnp.float32),
        "ln1w": jnp.ones((1, d_model), jnp.float32),
        "ln1b": jnp.zeros((1, d_model), jnp.float32),
        # conv1: nn.Conv1d(d_model, d_ff, 1) weight [d_ff, d_model, 1] -> W1 = w[:,:,0].T
        "w1": s * jax.random.normal(ks[5], (d_model, d_ff), jnp.float32),
        "b1": s * jax.random.normal(ks[6], (1, d_ff), jnp.float32),
        # conv2: nn.Conv1d(d_ff, d_model, 1) weight [d_model, d_ff, 1] -> W2 = w[:,:,0].T
        "w2": s * jax.random.normal(ks[7], (d_ff, d_model), jnp.float32),
        "b2": jnp.zeros((1, d_model), jnp.float32),
        "ln2w": jnp.ones((1, d_model), jnp.float32),
        "ln2b": jnp.zeros((1, d_model), jnp.float32),
    }


if __name__ == "__main__":
    B, L, D = 2, 8, 32
    D_FF = 4 * D  # 128
    key = jax.random.PRNGKey(0)
    kx, kp = jax.random.split(key)
    x = jax.random.normal(kx, (B, L, D), jnp.float32)
    params = init_params(kp, D, D_FF)
    fused = prepare_encoder_params(params)     # one-time host-side fusion

    try:
        out, attn = encoder_layer(x, fused, return_attn=True)
    except Exception:
        # jax versions without BlockSpec(pipeline_mode=...): fall back to the
        # default double-buffered weight specs (correctness identical).
        out, attn = encoder_layer(x, fused, return_attn=True,
                                  single_buffer_weights=False)

    out = jax.block_until_ready(out)
    attn = jax.block_until_ready(attn)

    ref_out, ref_attn = encoder_layer_ref(x, params)
    # tolerance sized for bf16 MXU operands (fp32 accumulate, fp32 LN/softmax)
    np.testing.assert_allclose(np.asarray(out), np.asarray(ref_out),
                               rtol=2e-2, atol=2e-2)
    np.testing.assert_allclose(np.asarray(attn), np.asarray(ref_attn),
                               rtol=2e-2, atol=2e-2)
    print("KERNEL_OK")
</pallas_src>

<mosaic_0001>
module attributes {stable_mosaic.version = 11 : i64} {
  func.func @kernel(%arg0: i32, %arg1: memref<1x8x32xf32, #tpu.memory_space<vmem>>, %arg2: memref<32x96xbf16, #tpu.memory_space<vmem>>, %arg3: memref<1x96xf32, #tpu.memory_space<vmem>>, %arg4: memref<32x32xbf16, #tpu.memory_space<vmem>>, %arg5: memref<1x32xf32, #tpu.memory_space<vmem>>, %arg6: memref<1x32xf32, #tpu.memory_space<vmem>>, %arg7: memref<1x32xf32, #tpu.memory_space<vmem>>, %arg8: memref<32x128xbf16, #tpu.memory_space<vmem>>, %arg9: memref<1x128xf32, #tpu.memory_space<vmem>>, %arg10: memref<128x32xbf16, #tpu.memory_space<vmem>>, %arg11: memref<1x32xf32, #tpu.memory_space<vmem>>, %arg12: memref<1x32xf32, #tpu.memory_space<vmem>>, %arg13: memref<1x32xf32, #tpu.memory_space<vmem>>, %arg14: memref<1x8x32xf32, #tpu.memory_space<vmem>>, %arg15: memref<1x4x8x8xf32, #tpu.memory_space<vmem>>) attributes {dimension_semantics = [#tpu.dimension_semantics<parallel>], iteration_bounds = array<i64: 2>, scalar_prefetch = 0 : i64, scratch_operands = 0 : i64, tpu.core_type = #tpu.core_type<tc>, window_params = [{transform_indices = @transform_0, window_bounds = array<i64: 1, 8, 32>}, {pipeline_mode = #tpu.pipeline_mode<synchronous>, transform_indices = @transform_1, window_bounds = array<i64: 32, 96>}, {pipeline_mode = #tpu.pipeline_mode<synchronous>, transform_indices = @transform_2, window_bounds = array<i64: 1, 96>}, {pipeline_mode = #tpu.pipeline_mode<synchronous>, transform_indices = @transform_3, window_bounds = array<i64: 32, 32>}, {pipeline_mode = #tpu.pipeline_mode<synchronous>, transform_indices = @transform_4, window_bounds = array<i64: 1, 32>}, {pipeline_mode = #tpu.pipeline_mode<synchronous>, transform_indices = @transform_5, window_bounds = array<i64: 1, 32>}, {pipeline_mode = #tpu.pipeline_mode<synchronous>, transform_indices = @transform_6, window_bounds = array<i64: 1, 32>}, {pipeline_mode = #tpu.pipeline_mode<synchronous>, transform_indices = @transform_7, window_bounds = array<i64: 32, 128>}, {pipeline_mode = #tpu.pipeline_mode<synchronous>, transform_indices = @transform_8, window_bounds = array<i64: 1, 128>}, {pipeline_mode = #tpu.pipeline_mode<synchronous>, transform_indices = @transform_9, window_bounds = array<i64: 128, 32>}, {pipeline_mode = #tpu.pipeline_mode<synchronous>, transform_indices = @transform_10, window_bounds = array<i64: 1, 32>}, {pipeline_mode = #tpu.pipeline_mode<synchronous>, transform_indices = @transform_11, window_bounds = array<i64: 1, 32>}, {pipeline_mode = #tpu.pipeline_mode<synchronous>, transform_indices = @transform_12, window_bounds = array<i64: 1, 32>}, {transform_indices = @transform_13, window_bounds = array<i64: 1, 8, 32>}, {transform_indices = @transform_14, window_bounds = array<i64: 1, 4, 8, 8>}]} {
    %c0 = arith.constant 0 : index
    %c0_0 = arith.constant 0 : index
    %c0_1 = arith.constant 0 : index
    %0 = vector.load %arg1[%c0, %c0_0, %c0_1] : memref<1x8x32xf32, #tpu.memory_space<vmem>>, vector<1x8x32xf32>
    %1 = vector.shape_cast %0 : vector<1x8x32xf32> to vector<8x32xf32>
    %2 = arith.truncf %1 : vector<8x32xf32> to vector<8x32xbf16>
    %c0_2 = arith.constant 0 : index
    %c0_3 = arith.constant 0 : index
    %3 = vector.load %arg2[%c0_2, %c0_3] : memref<32x96xbf16, #tpu.memory_space<vmem>>, vector<32x96xbf16>
    %cst = arith.constant dense<0.000000e+00> : vector<8x96xf32>
    %4 = tpu.matmul %2, %3, %cst {dimension_numbers = #tpu.dot_dimension_numbers<[1], [0], [0], [1], [0, 0, 1, 1], [], []>} : vector<8x32xbf16>, vector<32x96xbf16>, vector<8x96xf32> -> vector<8x96xf32>
    %c0_4 = arith.constant 0 : index
    %c0_5 = arith.constant 0 : index
    %5 = vector.load %arg3[%c0_4, %c0_5] : memref<1x96xf32, #tpu.memory_space<vmem>>, vector<1x96xf32>
    %6 = vector.broadcast %5 : vector<1x96xf32> to vector<8x96xf32>
    %7 = arith.addf %4, %6 : vector<8x96xf32>
    %8 = vector.extract_strided_slice %7 {offsets = [0, 0], sizes = [8, 32], strides = [1, 1]} : vector<8x96xf32> to vector<8x32xf32>
    %9 = vector.extract_strided_slice %7 {offsets = [0, 32], sizes = [8, 32], strides = [1, 1]} : vector<8x96xf32> to vector<8x32xf32>
    %10 = vector.extract_strided_slice %7 {offsets = [0, 64], sizes = [8, 32], strides = [1, 1]} : vector<8x96xf32> to vector<8x32xf32>
    %cst_6 = arith.constant 0.000000e+00 : f32
    %11 = vector.broadcast %cst_6 : f32 to vector<8x32xf32>
    %12 = vector.extract_strided_slice %8 {offsets = [0, 0], sizes = [8, 8], strides = [1, 1]} : vector<8x32xf32> to vector<8x8xf32>
    %13 = arith.truncf %12 : vector<8x8xf32> to vector<8x8xbf16>
    %14 = vector.extract_strided_slice %9 {offsets = [0, 0], sizes = [8, 8], strides = [1, 1]} : vector<8x32xf32> to vector<8x8xf32>
    %15 = arith.truncf %14 : vector<8x8xf32> to vector<8x8xbf16>
    %16 = vector.extract_strided_slice %10 {offsets = [0, 0], sizes = [8, 8], strides = [1, 1]} : vector<8x32xf32> to vector<8x8xf32>
    %17 = arith.truncf %16 : vector<8x8xf32> to vector<8x8xbf16>
    %cst_7 = arith.constant dense<0.000000e+00> : vector<8x8xf32>
    %18 = tpu.matmul %13, %15, %cst_7 {dimension_numbers = #tpu.dot_dimension_numbers<[1], [1], [0], [0], [0, 0, 1, 0], [], []>} : vector<8x8xbf16>, vector<8x8xbf16>, vector<8x8xf32> -> vector<8x8xf32>
    %cst_8 = arith.constant dense<0xFF800000> : vector<8xf32>
    %19 = vector.multi_reduction <maximumf>, %18, %cst_8 [1] : vector<8x8xf32> to vector<8xf32>
    %20 = vector.shape_cast %19 : vector<8xf32> to vector<8x1xf32>
    %21 = vector.broadcast %20 : vector<8x1xf32> to vector<8x8xf32>
    %22 = arith.subf %18, %21 : vector<8x8xf32>
    %23 = math.exp %22 : vector<8x8xf32>
    %cst_9 = arith.constant dense<0.000000e+00> : vector<8xf32>
    %24 = vector.multi_reduction <add>, %23, %cst_9 [1] : vector<8x8xf32> to vector<8xf32>
    %25 = vector.shape_cast %24 : vector<8xf32> to vector<8x1xf32>
    %26 = tpu.reciprocal %25 : vector<8x1xf32> -> vector<8x1xf32>
    %27 = vector.broadcast %26 : vector<8x1xf32> to vector<8x8xf32>
    %28 = arith.mulf %23, %27 : vector<8x8xf32>
    %c0_10 = arith.constant 0 : index
    %c0_11 = arith.constant 0 : index
    %c0_12 = arith.constant 0 : index
    %c0_13 = arith.constant 0 : index
    %29 = vector.load %arg15[%c0_10, %c0_11, %c0_12, %c0_13] : memref<1x4x8x8xf32, #tpu.memory_space<vmem>>, vector<1x1x8x8xf32>
    %30 = vector.shape_cast %29 : vector<1x1x8x8xf32> to vector<8x8xf32>
    %31 = vector.shape_cast %28 : vector<8x8xf32> to vector<1x1x8x8xf32>
    tpu.vector_store %arg15[%c0_10, %c0_11, %c0_12, %c0_13], %31 {strides = array<i32>} : memref<1x4x8x8xf32, #tpu.memory_space<vmem>>, vector<1x1x8x8xf32>,
    %32 = arith.truncf %28 : vector<8x8xf32> to vector<8x8xbf16>
    %cst_14 = arith.constant dense<0.000000e+00> : vector<8x8xf32>
    %33 = tpu.matmul %32, %17, %cst_14 {dimension_numbers = #tpu.dot_dimension_numbers<[1], [0], [0], [1], [0, 0, 1, 1], [], []>} : vector<8x8xbf16>, vector<8x8xbf16>, vector<8x8xf32> -> vector<8x8xf32>
    %34 = arith.truncf %33 : vector<8x8xf32> to vector<8x8xbf16>
    %c0_15 = arith.constant 0 : index
    %c0_16 = arith.constant 0 : index
    %35 = vector.load %arg4[%c0_15, %c0_16] : memref<32x32xbf16, #tpu.memory_space<vmem>>, vector<8x32xbf16>
    %cst_17 = arith.constant dense<0.000000e+00> : vector<8x32xf32>
    %36 = tpu.matmul %34, %35, %cst_17 {dimension_numbers = #tpu.dot_dimension_numbers<[1], [0], [0], [1], [0, 0, 1, 1], [], []>} : vector<8x8xbf16>, vector<8x32xbf16>, vector<8x32xf32> -> vector<8x32xf32>
    %37 = arith.addf %11, %36 : vector<8x32xf32>
    %38 = vector.extract_strided_slice %8 {offsets = [0, 8], sizes = [8, 8], strides = [1, 1]} : vector<8x32xf32> to vector<8x8xf32>
    %39 = arith.truncf %38 : vector<8x8xf32> to vector<8x8xbf16>
    %40 = vector.extract_strided_slice %9 {offsets = [0, 8], sizes = [8, 8], strides = [1, 1]} : vector<8x32xf32> to vector<8x8xf32>
    %41 = arith.truncf %40 : vector<8x8xf32> to vector<8x8xbf16>
    %42 = vector.extract_strided_slice %10 {offsets = [0, 8], sizes = [8, 8], strides = [1, 1]} : vector<8x32xf32> to vector<8x8xf32>
    %43 = arith.truncf %42 : vector<8x8xf32> to vector<8x8xbf16>
    %cst_18 = arith.constant dense<0.000000e+00> : vector<8x8xf32>
    %44 = tpu.matmul %39, %41, %cst_18 {dimension_numbers = #tpu.dot_dimension_numbers<[1], [1], [0], [0], [0, 0, 1, 0], [], []>} : vector<8x8xbf16>, vector<8x8xbf16>, vector<8x8xf32> -> vector<8x8xf32>
    %cst_19 = arith.constant dense<0xFF800000> : vector<8xf32>
    %45 = vector.multi_reduction <maximumf>, %44, %cst_19 [1] : vector<8x8xf32> to vector<8xf32>
    %46 = vector.shape_cast %45 : vector<8xf32> to vector<8x1xf32>
    %47 = vector.broadcast %46 : vector<8x1xf32> to vector<8x8xf32>
    %48 = arith.subf %44, %47 : vector<8x8xf32>
    %49 = math.exp %48 : vector<8x8xf32>
    %cst_20 = arith.constant dense<0.000000e+00> : vector<8xf32>
    %50 = vector.multi_reduction <add>, %49, %cst_20 [1] : vector<8x8xf32> to vector<8xf32>
    %51 = vector.shape_cast %50 : vector<8xf32> to vector<8x1xf32>
    %52 = tpu.reciprocal %51 : vector<8x1xf32> -> vector<8x1xf32>
    %53 = vector.broadcast %52 : vector<8x1xf32> to vector<8x8xf32>
    %54 = arith.mulf %49, %53 : vector<8x8xf32>
    %c0_21 = arith.constant 0 : index
    %c1 = arith.constant 1 : index
    %c0_22 = arith.constant 0 : index
    %c0_23 = arith.constant 0 : index
    %55 = vector.load %arg15[%c0_21, %c1, %c0_22, %c0_23] : memref<1x4x8x8xf32, #tpu.memory_space<vmem>>, vector<1x1x8x8xf32>
    %56 = vector.shape_cast %55 : vector<1x1x8x8xf32> to vector<8x8xf32>
    %57 = vector.shape_cast %54 : vector<8x8xf32> to vector<1x1x8x8xf32>
    tpu.vector_store %arg15[%c0_21, %c1, %c0_22, %c0_23], %57 {strides = array<i32>} : memref<1x4x8x8xf32, #tpu.memory_space<vmem>>, vector<1x1x8x8xf32>,
    %58 = arith.truncf %54 : vector<8x8xf32> to vector<8x8xbf16>
    %cst_24 = arith.constant dense<0.000000e+00> : vector<8x8xf32>
    %59 = tpu.matmul %58, %43, %cst_24 {dimension_numbers = #tpu.dot_dimension_numbers<[1], [0], [0], [1], [0, 0, 1, 1], [], []>} : vector<8x8xbf16>, vector<8x8xbf16>, vector<8x8xf32> -> vector<8x8xf32>
    %60 = arith.truncf %59 : vector<8x8xf32> to vector<8x8xbf16>
    %c8 = arith.constant 8 : index
    %c0_25 = arith.constant 0 : index
    %61 = vector.load %arg4[%c8, %c0_25] : memref<32x32xbf16, #tpu.memory_space<vmem>>, vector<8x32xbf16>
    %cst_26 = arith.constant dense<0.000000e+00> : vector<8x32xf32>
    %62 = tpu.matmul %60, %61, %cst_26 {dimension_numbers = #tpu.dot_dimension_numbers<[1], [0], [0], [1], [0, 0, 1, 1], [], []>} : vector<8x8xbf16>, vector<8x32xbf16>, vector<8x32xf32> -> vector<8x32xf32>
    %63 = arith.addf %37, %62 : vector<8x32xf32>
    %64 = vector.extract_strided_slice %8 {offsets = [0, 16], sizes = [8, 8], strides = [1, 1]} : vector<8x32xf32> to vector<8x8xf32>
    %65 = arith.truncf %64 : vector<8x8xf32> to vector<8x8xbf16>
    %66 = vector.extract_strided_slice %9 {offsets = [0, 16], sizes = [8, 8], strides = [1, 1]} : vector<8x32xf32> to vector<8x8xf32>
    %67 = arith.truncf %66 : vector<8x8xf32> to vector<8x8xbf16>
    %68 = vector.extract_strided_slice %10 {offsets = [0, 16], sizes = [8, 8], strides = [1, 1]} : vector<8x32xf32> to vector<8x8xf32>
    %69 = arith.truncf %68 : vector<8x8xf32> to vector<8x8xbf16>
    %cst_27 = arith.constant dense<0.000000e+00> : vector<8x8xf32>
    %70 = tpu.matmul %65, %67, %cst_27 {dimension_numbers = #tpu.dot_dimension_numbers<[1], [1], [0], [0], [0, 0, 1, 0], [], []>} : vector<8x8xbf16>, vector<8x8xbf16>, vector<8x8xf32> -> vector<8x8xf32>
    %cst_28 = arith.constant dense<0xFF800000> : vector<8xf32>
    %71 = vector.multi_reduction <maximumf>, %70, %cst_28 [1] : vector<8x8xf32> to vector<8xf32>
    %72 = vector.shape_cast %71 : vector<8xf32> to vector<8x1xf32>
    %73 = vector.broadcast %72 : vector<8x1xf32> to vector<8x8xf32>
    %74 = arith.subf %70, %73 : vector<8x8xf32>
    %75 = math.exp %74 : vector<8x8xf32>
    %cst_29 = arith.constant dense<0.000000e+00> : vector<8xf32>
    %76 = vector.multi_reduction <add>, %75, %cst_29 [1] : vector<8x8xf32> to vector<8xf32>
    %77 = vector.shape_cast %76 : vector<8xf32> to vector<8x1xf32>
    %78 = tpu.reciprocal %77 : vector<8x1xf32> -> vector<8x1xf32>
    %79 = vector.broadcast %78 : vector<8x1xf32> to vector<8x8xf32>
    %80 = arith.mulf %75, %79 : vector<8x8xf32>
    %c0_30 = arith.constant 0 : index
    %c2 = arith.constant 2 : index
    %c0_31 = arith.constant 0 : index
    %c0_32 = arith.constant 0 : index
    %81 = vector.load %arg15[%c0_30, %c2, %c0_31, %c0_32] : memref<1x4x8x8xf32, #tpu.memory_space<vmem>>, vector<1x1x8x8xf32>
    %82 = vector.shape_cast %81 : vector<1x1x8x8xf32> to vector<8x8xf32>
    %83 = vector.shape_cast %80 : vector<8x8xf32> to vector<1x1x8x8xf32>
    tpu.vector_store %arg15[%c0_30, %c2, %c0_31, %c0_32], %83 {strides = array<i32>} : memref<1x4x8x8xf32, #tpu.memory_space<vmem>>, vector<1x1x8x8xf32>,
    %84 = arith.truncf %80 : vector<8x8xf32> to vector<8x8xbf16>
    %cst_33 = arith.constant dense<0.000000e+00> : vector<8x8xf32>
    %85 = tpu.matmul %84, %69, %cst_33 {dimension_numbers = #tpu.dot_dimension_numbers<[1], [0], [0], [1], [0, 0, 1, 1], [], []>} : vector<8x8xbf16>, vector<8x8xbf16>, vector<8x8xf32> -> vector<8x8xf32>
    %86 = arith.truncf %85 : vector<8x8xf32> to vector<8x8xbf16>
    %c16 = arith.constant 16 : index
    %c0_34 = arith.constant 0 : index
    %87 = vector.load %arg4[%c16, %c0_34] : memref<32x32xbf16, #tpu.memory_space<vmem>>, vector<8x32xbf16>
    %cst_35 = arith.constant dense<0.000000e+00> : vector<8x32xf32>
    %88 = tpu.matmul %86, %87, %cst_35 {dimension_numbers = #tpu.dot_dimension_numbers<[1], [0], [0], [1], [0, 0, 1, 1], [], []>} : vector<8x8xbf16>, vector<8x32xbf16>, vector<8x32xf32> -> vector<8x32xf32>
    %89 = arith.addf %63, %88 : vector<8x32xf32>
    %90 = vector.extract_strided_slice %8 {offsets = [0, 24], sizes = [8, 8], strides = [1, 1]} : vector<8x32xf32> to vector<8x8xf32>
    %91 = arith.truncf %90 : vector<8x8xf32> to vector<8x8xbf16>
    %92 = vector.extract_strided_slice %9 {offsets = [0, 24], sizes = [8, 8], strides = [1, 1]} : vector<8x32xf32> to vector<8x8xf32>
    %93 = arith.truncf %92 : vector<8x8xf32> to vector<8x8xbf16>
    %94 = vector.extract_strided_slice %10 {offsets = [0, 24], sizes = [8, 8], strides = [1, 1]} : vector<8x32xf32> to vector<8x8xf32>
    %95 = arith.truncf %94 : vector<8x8xf32> to vector<8x8xbf16>
    %cst_36 = arith.constant dense<0.000000e+00> : vector<8x8xf32>
    %96 = tpu.matmul %91, %93, %cst_36 {dimension_numbers = #tpu.dot_dimension_numbers<[1], [1], [0], [0], [0, 0, 1, 0], [], []>} : vector<8x8xbf16>, vector<8x8xbf16>, vector<8x8xf32> -> vector<8x8xf32>
    %cst_37 = arith.constant dense<0xFF800000> : vector<8xf32>
    %97 = vector.multi_reduction <maximumf>, %96, %cst_37 [1] : vector<8x8xf32> to vector<8xf32>
    %98 = vector.shape_cast %97 : vector<8xf32> to vector<8x1xf32>
    %99 = vector.broadcast %98 : vector<8x1xf32> to vector<8x8xf32>
    %100 = arith.subf %96, %99 : vector<8x8xf32>
    %101 = math.exp %100 : vector<8x8xf32>
    %cst_38 = arith.constant dense<0.000000e+00> : vector<8xf32>
    %102 = vector.multi_reduction <add>, %101, %cst_38 [1] : vector<8x8xf32> to vector<8xf32>
    %103 = vector.shape_cast %102 : vector<8xf32> to vector<8x1xf32>
    %104 = tpu.reciprocal %103 : vector<8x1xf32> -> vector<8x1xf32>
    %105 = vector.broadcast %104 : vector<8x1xf32> to vector<8x8xf32>
    %106 = arith.mulf %101, %105 : vector<8x8xf32>
    %c0_39 = arith.constant 0 : index
    %c3 = arith.constant 3 : index
    %c0_40 = arith.constant 0 : index
    %c0_41 = arith.constant 0 : index
    %107 = vector.load %arg15[%c0_39, %c3, %c0_40, %c0_41] : memref<1x4x8x8xf32, #tpu.memory_space<vmem>>, vector<1x1x8x8xf32>
    %108 = vector.shape_cast %107 : vector<1x1x8x8xf32> to vector<8x8xf32>
    %109 = vector.shape_cast %106 : vector<8x8xf32> to vector<1x1x8x8xf32>
    tpu.vector_store %arg15[%c0_39, %c3, %c0_40, %c0_41], %109 {strides = array<i32>} : memref<1x4x8x8xf32, #tpu.memory_space<vmem>>, vector<1x1x8x8xf32>,
    %110 = arith.truncf %106 : vector<8x8xf32> to vector<8x8xbf16>
    %cst_42 = arith.constant dense<0.000000e+00> : vector<8x8xf32>
    %111 = tpu.matmul %110, %95, %cst_42 {dimension_numbers = #tpu.dot_dimension_numbers<[1], [0], [0], [1], [0, 0, 1, 1], [], []>} : vector<8x8xbf16>, vector<8x8xbf16>, vector<8x8xf32> -> vector<8x8xf32>
    %112 = arith.truncf %111 : vector<8x8xf32> to vector<8x8xbf16>
    %c24 = arith.constant 24 : index
    %c0_43 = arith.constant 0 : index
    %113 = vector.load %arg4[%c24, %c0_43] : memref<32x32xbf16, #tpu.memory_space<vmem>>, vector<8x32xbf16>
    %cst_44 = arith.constant dense<0.000000e+00> : vector<8x32xf32>
    %114 = tpu.matmul %112, %113, %cst_44 {dimension_numbers = #tpu.dot_dimension_numbers<[1], [0], [0], [1], [0, 0, 1, 1], [], []>} : vector<8x8xbf16>, vector<8x32xbf16>, vector<8x32xf32> -> vector<8x32xf32>
    %115 = arith.addf %89, %114 : vector<8x32xf32>
    %c0_45 = arith.constant 0 : index
    %c0_46 = arith.constant 0 : index
    %116 = vector.load %arg5[%c0_45, %c0_46] : memref<1x32xf32, #tpu.memory_space<vmem>>, vector<1x32xf32>
    %117 = vector.broadcast %116 : vector<1x32xf32> to vector<8x32xf32>
    %118 = arith.addf %115, %117 : vector<8x32xf32>
    %119 = arith.addf %1, %118 : vector<8x32xf32>
    %cst_47 = arith.constant dense<0.000000e+00> : vector<8xf32>
    %120 = vector.multi_reduction <add>, %119, %cst_47 [1] : vector<8x32xf32> to vector<8xf32>
    %121 = vector.shape_cast %120 : vector<8xf32> to vector<8x1xf32>
    %cst_48 = arith.constant 3.200000e+01 : f32
    %122 = vector.broadcast %cst_48 : f32 to vector<8x1xf32>
    %123 = arith.divf %121, %122 : vector<8x1xf32>
    %124 = vector.broadcast %123 : vector<8x1xf32> to vector<8x32xf32>
    %125 = arith.subf %119, %124 : vector<8x32xf32>
    %126 = arith.mulf %125, %125 : vector<8x32xf32>
    %cst_49 = arith.constant dense<0.000000e+00> : vector<8xf32>
    %127 = vector.multi_reduction <add>, %126, %cst_49 [1] : vector<8x32xf32> to vector<8xf32>
    %128 = vector.shape_cast %127 : vector<8xf32> to vector<8x1xf32>
    %cst_50 = arith.constant 3.200000e+01 : f32
    %129 = vector.broadcast %cst_50 : f32 to vector<8x1xf32>
    %130 = arith.divf %128, %129 : vector<8x1xf32>
    %131 = vector.broadcast %123 : vector<8x1xf32> to vector<8x32xf32>
    %132 = arith.subf %119, %131 : vector<8x32xf32>
    %cst_51 = arith.constant 9.99999974E-6 : f32
    %133 = vector.broadcast %cst_51 : f32 to vector<8x1xf32>
    %134 = arith.addf %130, %133 : vector<8x1xf32>
    %135 = math.rsqrt %134 : vector<8x1xf32>
    %136 = vector.broadcast %135 : vector<8x1xf32> to vector<8x32xf32>
    %137 = arith.mulf %132, %136 : vector<8x32xf32>
    %c0_52 = arith.constant 0 : index
    %c0_53 = arith.constant 0 : index
    %138 = vector.load %arg6[%c0_52, %c0_53] : memref<1x32xf32, #tpu.memory_space<vmem>>, vector<1x32xf32>
    %139 = vector.broadcast %138 : vector<1x32xf32> to vector<8x32xf32>
    %140 = arith.mulf %137, %139 : vector<8x32xf32>
    %c0_54 = arith.constant 0 : index
    %c0_55 = arith.constant 0 : index
    %141 = vector.load %arg7[%c0_54, %c0_55] : memref<1x32xf32, #tpu.memory_space<vmem>>, vector<1x32xf32>
    %142 = vector.broadcast %141 : vector<1x32xf32> to vector<8x32xf32>
    %143 = arith.addf %140, %142 : vector<8x32xf32>
    %144 = arith.truncf %143 : vector<8x32xf32> to vector<8x32xbf16>
    %c0_56 = arith.constant 0 : index
    %c0_57 = arith.constant 0 : index
    %145 = vector.load %arg8[%c0_56, %c0_57] : memref<32x128xbf16, #tpu.memory_space<vmem>>, vector<32x128xbf16>
    %cst_58 = arith.constant dense<0.000000e+00> : vector<8x128xf32>
    %146 = tpu.matmul %144, %145, %cst_58 {dimension_numbers = #tpu.dot_dimension_numbers<[1], [0], [0], [1], [0, 0, 1, 1], [], []>} : vector<8x32xbf16>, vector<32x128xbf16>, vector<8x128xf32> -> vector<8x128xf32>
    %c0_59 = arith.constant 0 : index
    %c0_60 = arith.constant 0 : index
    %147 = vector.load %arg9[%c0_59, %c0_60] : memref<1x128xf32, #tpu.memory_space<vmem>>, vector<1x128xf32>
    %148 = vector.broadcast %147 : vector<1x128xf32> to vector<8x128xf32>
    %149 = arith.addf %146, %148 : vector<8x128xf32>
    %cst_61 = arith.constant 0.000000e+00 : f32
    %150 = vector.broadcast %cst_61 : f32 to vector<8x128xf32>
    %151 = arith.maximumf %149, %150 : vector<8x128xf32>
    %152 = arith.truncf %151 : vector<8x128xf32> to vector<8x128xbf16>
    %c0_62 = arith.constant 0 : index
    %c0_63 = arith.constant 0 : index
    %153 = vector.load %arg10[%c0_62, %c0_63] : memref<128x32xbf16, #tpu.memory_space<vmem>>, vector<128x32xbf16>
    %cst_64 = arith.constant dense<0.000000e+00> : vector<8x32xf32>
    %154 = tpu.matmul %152, %153, %cst_64 {dimension_numbers = #tpu.dot_dimension_numbers<[1], [0], [0], [1], [0, 0, 1, 1], [], []>} : vector<8x128xbf16>, vector<128x32xbf16>, vector<8x32xf32> -> vector<8x32xf32>
    %c0_65 = arith.constant 0 : index
    %c0_66 = arith.constant 0 : index
    %155 = vector.load %arg11[%c0_65, %c0_66] : memref<1x32xf32, #tpu.memory_space<vmem>>, vector<1x32xf32>
    %156 = vector.broadcast %155 : vector<1x32xf32> to vector<8x32xf32>
    %157 = arith.addf %154, %156 : vector<8x32xf32>
    %158 = arith.addf %143, %157 : vector<8x32xf32>
    %cst_67 = arith.constant dense<0.000000e+00> : vector<8xf32>
    %159 = vector.multi_reduction <add>, %158, %cst_67 [1] : vector<8x32xf32> to vector<8xf32>
    %160 = vector.shape_cast %159 : vector<8xf32> to vector<8x1xf32>
    %cst_68 = arith.constant 3.200000e+01 : f32
    %161 = vector.broadcast %cst_68 : f32 to vector<8x1xf32>
    %162 = arith.divf %160, %161 : vector<8x1xf32>
    %163 = vector.broadcast %162 : vector<8x1xf32> to vector<8x32xf32>
    %164 = arith.subf %158, %163 : vector<8x32xf32>
    %165 = arith.mulf %164, %164 : vector<8x32xf32>
    %cst_69 = arith.constant dense<0.000000e+00> : vector<8xf32>
    %166 = vector.multi_reduction <add>, %165, %cst_69 [1] : vector<8x32xf32> to vector<8xf32>
    %167 = vector.shape_cast %166 : vector<8xf32> to vector<8x1xf32>
    %cst_70 = arith.constant 3.200000e+01 : f32
    %168 = vector.broadcast %cst_70 : f32 to vector<8x1xf32>
    %169 = arith.divf %167, %168 : vector<8x1xf32>
    %170 = vector.broadcast %162 : vector<8x1xf32> to vector<8x32xf32>
    %171 = arith.subf %158, %170 : vector<8x32xf32>
    %cst_71 = arith.constant 9.99999974E-6 : f32
    %172 = vector.broadcast %cst_71 : f32 to vector<8x1xf32>
    %173 = arith.addf %169, %172 : vector<8x1xf32>
    %174 = math.rsqrt %173 : vector<8x1xf32>
    %175 = vector.broadcast %174 : vector<8x1xf32> to vector<8x32xf32>
    %176 = arith.mulf %171, %175 : vector<8x32xf32>
    %c0_72 = arith.constant 0 : index
    %c0_73 = arith.constant 0 : index
    %177 = vector.load %arg12[%c0_72, %c0_73] : memref<1x32xf32, #tpu.memory_space<vmem>>, vector<1x32xf32>
    %178 = vector.broadcast %177 : vector<1x32xf32> to vector<8x32xf32>
    %179 = arith.mulf %176, %178 : vector<8x32xf32>
    %c0_74 = arith.constant 0 : index
    %c0_75 = arith.constant 0 : index
    %180 = vector.load %arg13[%c0_74, %c0_75] : memref<1x32xf32, #tpu.memory_space<vmem>>, vector<1x32xf32>
    %181 = vector.broadcast %180 : vector<1x32xf32> to vector<8x32xf32>
    %182 = arith.addf %179, %181 : vector<8x32xf32>
    %c0_76 = arith.constant 0 : index
    %c0_77 = arith.constant 0 : index
    %c0_78 = arith.constant 0 : index
    %183 = vector.load %arg14[%c0_76, %c0_77, %c0_78] : memref<1x8x32xf32, #tpu.memory_space<vmem>>, vector<1x8x32xf32>
    %184 = vector.shape_cast %183 : vector<1x8x32xf32> to vector<8x32xf32>
    %185 = vector.shape_cast %182 : vector<8x32xf32> to vector<1x8x32xf32>
    tpu.vector_store %arg14[%c0_76, %c0_77, %c0_78], %185 {strides = array<i32>} : memref<1x8x32xf32, #tpu.memory_space<vmem>>, vector<1x8x32xf32>,
    return
  }
  func.func @transform_0(%arg0: i32) -> (i32, i32, i32) {
    %c0_i32 = arith.constant 0 : i32
    %c0_i32_0 = arith.constant 0 : i32
    %c0_i32_1 = arith.constant 0 : i32
    return %arg0, %c0_i32, %c0_i32_0 : i32, i32, i32
  }
  func.func @transform_1(%arg0: i32) -> (i32, i32) {
    %c0_i32 = arith.constant 0 : i32
    %c0_i32_0 = arith.constant 0 : i32
    %c0_i32_1 = arith.constant 0 : i32
    return %c0_i32, %c0_i32_0 : i32, i32
  }
  func.func @transform_2(%arg0: i32) -> (i32, i32) {
    %c0_i32 = arith.constant 0 : i32
    %c0_i32_0 = arith.constant 0 : i32
    %c0_i32_1 = arith.constant 0 : i32
    return %c0_i32, %c0_i32_0 : i32, i32
  }
  func.func @transform_3(%arg0: i32) -> (i32, i32) {
    %c0_i32 = arith.constant 0 : i32
    %c0_i32_0 = arith.constant 0 : i32
    %c0_i32_1 = arith.constant 0 : i32
    return %c0_i32, %c0_i32_0 : i32, i32
  }
  func.func @transform_4(%arg0: i32) -> (i32, i32) {
    %c0_i32 = arith.constant 0 : i32
    %c0_i32_0 = arith.constant 0 : i32
    %c0_i32_1 = arith.constant 0 : i32
    return %c0_i32, %c0_i32_0 : i32, i32
  }
  func.func @transform_5(%arg0: i32) -> (i32, i32) {
    %c0_i32 = arith.constant 0 : i32
    %c0_i32_0 = arith.constant 0 : i32
    %c0_i32_1 = arith.constant 0 : i32
    return %c0_i32, %c0_i32_0 : i32, i32
  }
  func.func @transform_6(%arg0: i32) -> (i32, i32) {
    %c0_i32 = arith.constant 0 : i32
    %c0_i32_0 = arith.constant 0 : i32
    %c0_i32_1 = arith.constant 0 : i32
    return %c0_i32, %c0_i32_0 : i32, i32
  }
  func.func @transform_7(%arg0: i32) -> (i32, i32) {
    %c0_i32 = arith.constant 0 : i32
    %c0_i32_0 = arith.constant 0 : i32
    %c0_i32_1 = arith.constant 0 : i32
    return %c0_i32, %c0_i32_0 : i32, i32
  }
  func.func @transform_8(%arg0: i32) -> (i32, i32) {
    %c0_i32 = arith.constant 0 : i32
    %c0_i32_0 = arith.constant 0 : i32
    %c0_i32_1 = arith.constant 0 : i32
    return %c0_i32, %c0_i32_0 : i32, i32
  }
  func.func @transform_9(%arg0: i32) -> (i32, i32) {
    %c0_i32 = arith.constant 0 : i32
    %c0_i32_0 = arith.constant 0 : i32
    %c0_i32_1 = arith.constant 0 : i32
    return %c0_i32, %c0_i32_0 : i32, i32
  }
  func.func @transform_10(%arg0: i32) -> (i32, i32) {
    %c0_i32 = arith.constant 0 : i32
    %c0_i32_0 = arith.constant 0 : i32
    %c0_i32_1 = arith.constant 0 : i32
    return %c0_i32, %c0_i32_0 : i32, i32
  }
  func.func @transform_11(%arg0: i32) -> (i32, i32) {
    %c0_i32 = arith.constant 0 : i32
    %c0_i32_0 = arith.constant 0 : i32
    %c0_i32_1 = arith.constant 0 : i32
    return %c0_i32, %c0_i32_0 : i32, i32
  }
  func.func @transform_12(%arg0: i32) -> (i32, i32) {
    %c0_i32 = arith.constant 0 : i32
    %c0_i32_0 = arith.constant 0 : i32
    %c0_i32_1 = arith.constant 0 : i32
    return %c0_i32, %c0_i32_0 : i32, i32
  }
  func.func @transform_13(%arg0: i32) -> (i32, i32, i32) {
    %c0_i32 = arith.constant 0 : i32
    %c0_i32_0 = arith.constant 0 : i32
    %c0_i32_1 = arith.constant 0 : i32
    return %arg0, %c0_i32, %c0_i32_0 : i32, i32, i32
  }
  func.func @transform_14(%arg0: i32) -> (i32, i32, i32, i32) {
    %c0_i32 = arith.constant 0 : i32
    %c0_i32_0 = arith.constant 0 : i32
    %c0_i32_1 = arith.constant 0 : i32
    %c0_i32_2 = arith.constant 0 : i32
    return %arg0, %c0_i32, %c0_i32_0, %c0_i32_1 : i32, i32, i32, i32
  }
}

module attributes {stable_mosaic.version = 11 : i64} {
  func.func @kernel(%arg0: i32, %arg1: memref<1x8x32xf32, #tpu.memory_space<vmem>>, %arg2: memref<32x96xbf16, #tpu.memory_space<vmem>>, %arg3: memref<1x96xf32, #tpu.memory_space<vmem>>, %arg4: memref<32x32xbf16, #tpu.memory_space<vmem>>, %arg5: memref<1x32xf32, #tpu.memory_space<vmem>>, %arg6: memref<1x32xf32, #tpu.memory_space<vmem>>, %arg7: memref<1x32xf32, #tpu.memory_space<vmem>>, %arg8: memref<32x128xbf16, #tpu.memory_space<vmem>>, %arg9: memref<1x128xf32, #tpu.memory_space<vmem>>, %arg10: memref<128x32xbf16, #tpu.memory_space<vmem>>, %arg11: memref<1x32xf32, #tpu.memory_space<vmem>>, %arg12: memref<1x32xf32, #tpu.memory_space<vmem>>, %arg13: memref<1x32xf32, #tpu.memory_space<vmem>>, %arg14: memref<1x8x32xf32, #tpu.memory_space<vmem>>, %arg15: memref<1x4x8x8xf32, #tpu.memory_space<vmem>>) attributes {dimension_semantics = [#tpu.dimension_semantics<parallel>], iteration_bounds = array<i64: 2>, scalar_prefetch = 0 : i64, scratch_operands = 0 : i64, tpu.core_type = #tpu.core_type<tc>, window_params = [{transform_indices = @transform_0, window_bounds = array<i64: 1, 8, 32>}, {pipeline_mode = #tpu.pipeline_mode<synchronous>, transform_indices = @transform_1, window_bounds = array<i64: 32, 96>}, {pipeline_mode = #tpu.pipeline_mode<synchronous>, transform_indices = @transform_2, window_bounds = array<i64: 1, 96>}, {pipeline_mode = #tpu.pipeline_mode<synchronous>, transform_indices = @transform_3, window_bounds = array<i64: 32, 32>}, {pipeline_mode = #tpu.pipeline_mode<synchronous>, transform_indices = @transform_4, window_bounds = array<i64: 1, 32>}, {pipeline_mode = #tpu.pipeline_mode<synchronous>, transform_indices = @transform_5, window_bounds = array<i64: 1, 32>}, {pipeline_mode = #tpu.pipeline_mode<synchronous>, transform_indices = @transform_6, window_bounds = array<i64: 1, 32>}, {pipeline_mode = #tpu.pipeline_mode<synchronous>, transform_indices = @transform_7, window_bounds = array<i64: 32, 128>}, {pipeline_mode = #tpu.pipeline_mode<synchronous>, transform_indices = @transform_8, window_bounds = array<i64: 1, 128>}, {pipeline_mode = #tpu.pipeline_mode<synchronous>, transform_indices = @transform_9, window_bounds = array<i64: 128, 32>}, {pipeline_mode = #tpu.pipeline_mode<synchronous>, transform_indices = @transform_10, window_bounds = array<i64: 1, 32>}, {pipeline_mode = #tpu.pipeline_mode<synchronous>, transform_indices = @transform_11, window_bounds = array<i64: 1, 32>}, {pipeline_mode = #tpu.pipeline_mode<synchronous>, transform_indices = @transform_12, window_bounds = array<i64: 1, 32>}, {transform_indices = @transform_13, window_bounds = array<i64: 1, 8, 32>}, {transform_indices = @transform_14, window_bounds = array<i64: 1, 4, 8, 8>}]} {
    %c0 = arith.constant 0 : index
    %c0_0 = arith.constant 0 : index
    %c0_1 = arith.constant 0 : index
    %0 = vector.load %arg1[%c0, %c0_0, %c0_1] : memref<1x8x32xf32, #tpu.memory_space<vmem>>, vector<1x8x32xf32>
    %1 = vector.shape_cast %0 : vector<1x8x32xf32> to vector<8x32xf32>
    %2 = arith.truncf %1 : vector<8x32xf32> to vector<8x32xbf16>
    %c0_2 = arith.constant 0 : index
    %c0_3 = arith.constant 0 : index
    %3 = vector.load %arg2[%c0_2, %c0_3] : memref<32x96xbf16, #tpu.memory_space<vmem>>, vector<32x96xbf16>
    %cst = arith.constant dense<0.000000e+00> : vector<8x96xf32>
    %4 = tpu.matmul %2, %3, %cst {dimension_numbers = #tpu.dot_dimension_numbers<[1], [0], [0], [1], [0, 0, 1, 1], [], []>} : vector<8x32xbf16>, vector<32x96xbf16>, vector<8x96xf32> -> vector<8x96xf32>
    %c0_4 = arith.constant 0 : index
    %c0_5 = arith.constant 0 : index
    %5 = vector.load %arg3[%c0_4, %c0_5] : memref<1x96xf32, #tpu.memory_space<vmem>>, vector<1x96xf32>
    %6 = vector.broadcast %5 : vector<1x96xf32> to vector<8x96xf32>
    %7 = arith.addf %4, %6 : vector<8x96xf32>
    %8 = vector.extract_strided_slice %7 {offsets = [0, 0], sizes = [8, 32], strides = [1, 1]} : vector<8x96xf32> to vector<8x32xf32>
    %9 = vector.extract_strided_slice %7 {offsets = [0, 32], sizes = [8, 32], strides = [1, 1]} : vector<8x96xf32> to vector<8x32xf32>
    %10 = vector.extract_strided_slice %7 {offsets = [0, 64], sizes = [8, 32], strides = [1, 1]} : vector<8x96xf32> to vector<8x32xf32>
    %cst_6 = arith.constant 0.000000e+00 : f32
    %11 = vector.broadcast %cst_6 : f32 to vector<8x32xf32>
    %12 = vector.extract_strided_slice %8 {offsets = [0, 0], sizes = [8, 8], strides = [1, 1]} : vector<8x32xf32> to vector<8x8xf32>
    %13 = arith.truncf %12 : vector<8x8xf32> to vector<8x8xbf16>
    %14 = vector.extract_strided_slice %9 {offsets = [0, 0], sizes = [8, 8], strides = [1, 1]} : vector<8x32xf32> to vector<8x8xf32>
    %15 = arith.truncf %14 : vector<8x8xf32> to vector<8x8xbf16>
    %16 = vector.extract_strided_slice %10 {offsets = [0, 0], sizes = [8, 8], strides = [1, 1]} : vector<8x32xf32> to vector<8x8xf32>
    %17 = arith.truncf %16 : vector<8x8xf32> to vector<8x8xbf16>
    %cst_7 = arith.constant dense<0.000000e+00> : vector<8x8xf32>
    %18 = tpu.matmul %13, %15, %cst_7 {dimension_numbers = #tpu.dot_dimension_numbers<[1], [1], [0], [0], [0, 0, 1, 0], [], []>} : vector<8x8xbf16>, vector<8x8xbf16>, vector<8x8xf32> -> vector<8x8xf32>
    %cst_8 = arith.constant dense<0xFF800000> : vector<8xf32>
    %19 = vector.multi_reduction <maximumf>, %18, %cst_8 [1] : vector<8x8xf32> to vector<8xf32>
    %20 = vector.shape_cast %19 : vector<8xf32> to vector<8x1xf32>
    %21 = vector.broadcast %20 : vector<8x1xf32> to vector<8x8xf32>
    %22 = arith.subf %18, %21 : vector<8x8xf32>
    %23 = math.exp %22 : vector<8x8xf32>
    %cst_9 = arith.constant dense<0.000000e+00> : vector<8xf32>
    %24 = vector.multi_reduction <add>, %23, %cst_9 [1] : vector<8x8xf32> to vector<8xf32>
    %25 = vector.shape_cast %24 : vector<8xf32> to vector<8x1xf32>
    %26 = tpu.reciprocal %25 : vector<8x1xf32> -> vector<8x1xf32>
    %27 = vector.broadcast %26 : vector<8x1xf32> to vector<8x8xf32>
    %28 = arith.mulf %23, %27 : vector<8x8xf32>
    %c0_10 = arith.constant 0 : index
    %c0_11 = arith.constant 0 : index
    %c0_12 = arith.constant 0 : index
    %c0_13 = arith.constant 0 : index
    %29 = vector.load %arg15[%c0_10, %c0_11, %c0_12, %c0_13] : memref<1x4x8x8xf32, #tpu.memory_space<vmem>>, vector<1x1x8x8xf32>
    %30 = vector.shape_cast %29 : vector<1x1x8x8xf32> to vector<8x8xf32>
    %31 = vector.shape_cast %28 : vector<8x8xf32> to vector<1x1x8x8xf32>
    tpu.vector_store %arg15[%c0_10, %c0_11, %c0_12, %c0_13], %31 {strides = array<i32>} : memref<1x4x8x8xf32, #tpu.memory_space<vmem>>, vector<1x1x8x8xf32>,
    %32 = arith.truncf %28 : vector<8x8xf32> to vector<8x8xbf16>
    %cst_14 = arith.constant dense<0.000000e+00> : vector<8x8xf32>
    %33 = tpu.matmul %32, %17, %cst_14 {dimension_numbers = #tpu.dot_dimension_numbers<[1], [0], [0], [1], [0, 0, 1, 1], [], []>} : vector<8x8xbf16>, vector<8x8xbf16>, vector<8x8xf32> -> vector<8x8xf32>
    %34 = arith.truncf %33 : vector<8x8xf32> to vector<8x8xbf16>
    %c0_15 = arith.constant 0 : index
    %c0_16 = arith.constant 0 : index
    %35 = vector.load %arg4[%c0_15, %c0_16] : memref<32x32xbf16, #tpu.memory_space<vmem>>, vector<8x32xbf16>
    %cst_17 = arith.constant dense<0.000000e+00> : vector<8x32xf32>
    %36 = tpu.matmul %34, %35, %cst_17 {dimension_numbers = #tpu.dot_dimension_numbers<[1], [0], [0], [1], [0, 0, 1, 1], [], []>} : vector<8x8xbf16>, vector<8x32xbf16>, vector<8x32xf32> -> vector<8x32xf32>
    %37 = arith.addf %11, %36 : vector<8x32xf32>
    %38 = vector.extract_strided_slice %8 {offsets = [0, 8], sizes = [8, 8], strides = [1, 1]} : vector<8x32xf32> to vector<8x8xf32>
    %39 = arith.truncf %38 : vector<8x8xf32> to vector<8x8xbf16>
    %40 = vector.extract_strided_slice %9 {offsets = [0, 8], sizes = [8, 8], strides = [1, 1]} : vector<8x32xf32> to vector<8x8xf32>
    %41 = arith.truncf %40 : vector<8x8xf32> to vector<8x8xbf16>
    %42 = vector.extract_strided_slice %10 {offsets = [0, 8], sizes = [8, 8], strides = [1, 1]} : vector<8x32xf32> to vector<8x8xf32>
    %43 = arith.truncf %42 : vector<8x8xf32> to vector<8x8xbf16>
    %cst_18 = arith.constant dense<0.000000e+00> : vector<8x8xf32>
    %44 = tpu.matmul %39, %41, %cst_18 {dimension_numbers = #tpu.dot_dimension_numbers<[1], [1], [0], [0], [0, 0, 1, 0], [], []>} : vector<8x8xbf16>, vector<8x8xbf16>, vector<8x8xf32> -> vector<8x8xf32>
    %cst_19 = arith.constant dense<0xFF800000> : vector<8xf32>
    %45 = vector.multi_reduction <maximumf>, %44, %cst_19 [1] : vector<8x8xf32> to vector<8xf32>
    %46 = vector.shape_cast %45 : vector<8xf32> to vector<8x1xf32>
    %47 = vector.broadcast %46 : vector<8x1xf32> to vector<8x8xf32>
    %48 = arith.subf %44, %47 : vector<8x8xf32>
    %49 = math.exp %48 : vector<8x8xf32>
    %cst_20 = arith.constant dense<0.000000e+00> : vector<8xf32>
    %50 = vector.multi_reduction <add>, %49, %cst_20 [1] : vector<8x8xf32> to vector<8xf32>
    %51 = vector.shape_cast %50 : vector<8xf32> to vector<8x1xf32>
    %52 = tpu.reciprocal %51 : vector<8x1xf32> -> vector<8x1xf32>
    %53 = vector.broadcast %52 : vector<8x1xf32> to vector<8x8xf32>
    %54 = arith.mulf %49, %53 : vector<8x8xf32>
    %c0_21 = arith.constant 0 : index
    %c1 = arith.constant 1 : index
    %c0_22 = arith.constant 0 : index
    %c0_23 = arith.constant 0 : index
    %55 = vector.load %arg15[%c0_21, %c1, %c0_22, %c0_23] : memref<1x4x8x8xf32, #tpu.memory_space<vmem>>, vector<1x1x8x8xf32>
    %56 = vector.shape_cast %55 : vector<1x1x8x8xf32> to vector<8x8xf32>
    %57 = vector.shape_cast %54 : vector<8x8xf32> to vector<1x1x8x8xf32>
    tpu.vector_store %arg15[%c0_21, %c1, %c0_22, %c0_23], %57 {strides = array<i32>} : memref<1x4x8x8xf32, #tpu.memory_space<vmem>>, vector<1x1x8x8xf32>,
    %58 = arith.truncf %54 : vector<8x8xf32> to vector<8x8xbf16>
    %cst_24 = arith.constant dense<0.000000e+00> : vector<8x8xf32>
    %59 = tpu.matmul %58, %43, %cst_24 {dimension_numbers = #tpu.dot_dimension_numbers<[1], [0], [0], [1], [0, 0, 1, 1], [], []>} : vector<8x8xbf16>, vector<8x8xbf16>, vector<8x8xf32> -> vector<8x8xf32>
    %60 = arith.truncf %59 : vector<8x8xf32> to vector<8x8xbf16>
    %c8 = arith.constant 8 : index
    %c0_25 = arith.constant 0 : index
    %61 = vector.load %arg4[%c8, %c0_25] : memref<32x32xbf16, #tpu.memory_space<vmem>>, vector<8x32xbf16>
    %cst_26 = arith.constant dense<0.000000e+00> : vector<8x32xf32>
    %62 = tpu.matmul %60, %61, %cst_26 {dimension_numbers = #tpu.dot_dimension_numbers<[1], [0], [0], [1], [0, 0, 1, 1], [], []>} : vector<8x8xbf16>, vector<8x32xbf16>, vector<8x32xf32> -> vector<8x32xf32>
    %63 = arith.addf %37, %62 : vector<8x32xf32>
    %64 = vector.extract_strided_slice %8 {offsets = [0, 16], sizes = [8, 8], strides = [1, 1]} : vector<8x32xf32> to vector<8x8xf32>
    %65 = arith.truncf %64 : vector<8x8xf32> to vector<8x8xbf16>
    %66 = vector.extract_strided_slice %9 {offsets = [0, 16], sizes = [8, 8], strides = [1, 1]} : vector<8x32xf32> to vector<8x8xf32>
    %67 = arith.truncf %66 : vector<8x8xf32> to vector<8x8xbf16>
    %68 = vector.extract_strided_slice %10 {offsets = [0, 16], sizes = [8, 8], strides = [1, 1]} : vector<8x32xf32> to vector<8x8xf32>
    %69 = arith.truncf %68 : vector<8x8xf32> to vector<8x8xbf16>
    %cst_27 = arith.constant dense<0.000000e+00> : vector<8x8xf32>
    %70 = tpu.matmul %65, %67, %cst_27 {dimension_numbers = #tpu.dot_dimension_numbers<[1], [1], [0], [0], [0, 0, 1, 0], [], []>} : vector<8x8xbf16>, vector<8x8xbf16>, vector<8x8xf32> -> vector<8x8xf32>
    %cst_28 = arith.constant dense<0xFF800000> : vector<8xf32>
    %71 = vector.multi_reduction <maximumf>, %70, %cst_28 [1] : vector<8x8xf32> to vector<8xf32>
    %72 = vector.shape_cast %71 : vector<8xf32> to vector<8x1xf32>
    %73 = vector.broadcast %72 : vector<8x1xf32> to vector<8x8xf32>
    %74 = arith.subf %70, %73 : vector<8x8xf32>
    %75 = math.exp %74 : vector<8x8xf32>
    %cst_29 = arith.constant dense<0.000000e+00> : vector<8xf32>
    %76 = vector.multi_reduction <add>, %75, %cst_29 [1] : vector<8x8xf32> to vector<8xf32>
    %77 = vector.shape_cast %76 : vector<8xf32> to vector<8x1xf32>
    %78 = tpu.reciprocal %77 : vector<8x1xf32> -> vector<8x1xf32>
    %79 = vector.broadcast %78 : vector<8x1xf32> to vector<8x8xf32>
    %80 = arith.mulf %75, %79 : vector<8x8xf32>
    %c0_30 = arith.constant 0 : index
    %c2 = arith.constant 2 : index
    %c0_31 = arith.constant 0 : index
    %c0_32 = arith.constant 0 : index
    %81 = vector.load %arg15[%c0_30, %c2, %c0_31, %c0_32] : memref<1x4x8x8xf32, #tpu.memory_space<vmem>>, vector<1x1x8x8xf32>
    %82 = vector.shape_cast %81 : vector<1x1x8x8xf32> to vector<8x8xf32>
    %83 = vector.shape_cast %80 : vector<8x8xf32> to vector<1x1x8x8xf32>
    tpu.vector_store %arg15[%c0_30, %c2, %c0_31, %c0_32], %83 {strides = array<i32>} : memref<1x4x8x8xf32, #tpu.memory_space<vmem>>, vector<1x1x8x8xf32>,
    %84 = arith.truncf %80 : vector<8x8xf32> to vector<8x8xbf16>
    %cst_33 = arith.constant dense<0.000000e+00> : vector<8x8xf32>
    %85 = tpu.matmul %84, %69, %cst_33 {dimension_numbers = #tpu.dot_dimension_numbers<[1], [0], [0], [1], [0, 0, 1, 1], [], []>} : vector<8x8xbf16>, vector<8x8xbf16>, vector<8x8xf32> -> vector<8x8xf32>
    %86 = arith.truncf %85 : vector<8x8xf32> to vector<8x8xbf16>
    %c16 = arith.constant 16 : index
    %c0_34 = arith.constant 0 : index
    %87 = vector.load %arg4[%c16, %c0_34] : memref<32x32xbf16, #tpu.memory_space<vmem>>, vector<8x32xbf16>
    %cst_35 = arith.constant dense<0.000000e+00> : vector<8x32xf32>
    %88 = tpu.matmul %86, %87, %cst_35 {dimension_numbers = #tpu.dot_dimension_numbers<[1], [0], [0], [1], [0, 0, 1, 1], [], []>} : vector<8x8xbf16>, vector<8x32xbf16>, vector<8x32xf32> -> vector<8x32xf32>
    %89 = arith.addf %63, %88 : vector<8x32xf32>
    %90 = vector.extract_strided_slice %8 {offsets = [0, 24], sizes = [8, 8], strides = [1, 1]} : vector<8x32xf32> to vector<8x8xf32>
    %91 = arith.truncf %90 : vector<8x8xf32> to vector<8x8xbf16>
    %92 = vector.extract_strided_slice %9 {offsets = [0, 24], sizes = [8, 8], strides = [1, 1]} : vector<8x32xf32> to vector<8x8xf32>
    %93 = arith.truncf %92 : vector<8x8xf32> to vector<8x8xbf16>
    %94 = vector.extract_strided_slice %10 {offsets = [0, 24], sizes = [8, 8], strides = [1, 1]} : vector<8x32xf32> to vector<8x8xf32>
    %95 = arith.truncf %94 : vector<8x8xf32> to vector<8x8xbf16>
    %cst_36 = arith.constant dense<0.000000e+00> : vector<8x8xf32>
    %96 = tpu.matmul %91, %93, %cst_36 {dimension_numbers = #tpu.dot_dimension_numbers<[1], [1], [0], [0], [0, 0, 1, 0], [], []>} : vector<8x8xbf16>, vector<8x8xbf16>, vector<8x8xf32> -> vector<8x8xf32>
    %cst_37 = arith.constant dense<0xFF800000> : vector<8xf32>
    %97 = vector.multi_reduction <maximumf>, %96, %cst_37 [1] : vector<8x8xf32> to vector<8xf32>
    %98 = vector.shape_cast %97 : vector<8xf32> to vector<8x1xf32>
    %99 = vector.broadcast %98 : vector<8x1xf32> to vector<8x8xf32>
    %100 = arith.subf %96, %99 : vector<8x8xf32>
    %101 = math.exp %100 : vector<8x8xf32>
    %cst_38 = arith.constant dense<0.000000e+00> : vector<8xf32>
    %102 = vector.multi_reduction <add>, %101, %cst_38 [1] : vector<8x8xf32> to vector<8xf32>
    %103 = vector.shape_cast %102 : vector<8xf32> to vector<8x1xf32>
    %104 = tpu.reciprocal %103 : vector<8x1xf32> -> vector<8x1xf32>
    %105 = vector.broadcast %104 : vector<8x1xf32> to vector<8x8xf32>
    %106 = arith.mulf %101, %105 : vector<8x8xf32>
    %c0_39 = arith.constant 0 : index
    %c3 = arith.constant 3 : index
    %c0_40 = arith.constant 0 : index
    %c0_41 = arith.constant 0 : index
    %107 = vector.load %arg15[%c0_39, %c3, %c0_40, %c0_41] : memref<1x4x8x8xf32, #tpu.memory_space<vmem>>, vector<1x1x8x8xf32>
    %108 = vector.shape_cast %107 : vector<1x1x8x8xf32> to vector<8x8xf32>
    %109 = vector.shape_cast %106 : vector<8x8xf32> to vector<1x1x8x8xf32>
    tpu.vector_store %arg15[%c0_39, %c3, %c0_40, %c0_41], %109 {strides = array<i32>} : memref<1x4x8x8xf32, #tpu.memory_space<vmem>>, vector<1x1x8x8xf32>,
    %110 = arith.truncf %106 : vector<8x8xf32> to vector<8x8xbf16>
    %cst_42 = arith.constant dense<0.000000e+00> : vector<8x8xf32>
    %111 = tpu.matmul %110, %95, %cst_42 {dimension_numbers = #tpu.dot_dimension_numbers<[1], [0], [0], [1], [0, 0, 1, 1], [], []>} : vector<8x8xbf16>, vector<8x8xbf16>, vector<8x8xf32> -> vector<8x8xf32>
    %112 = arith.truncf %111 : vector<8x8xf32> to vector<8x8xbf16>
    %c24 = arith.constant 24 : index
    %c0_43 = arith.constant 0 : index
    %113 = vector.load %arg4[%c24, %c0_43] : memref<32x32xbf16, #tpu.memory_space<vmem>>, vector<8x32xbf16>
    %cst_44 = arith.constant dense<0.000000e+00> : vector<8x32xf32>
    %114 = tpu.matmul %112, %113, %cst_44 {dimension_numbers = #tpu.dot_dimension_numbers<[1], [0], [0], [1], [0, 0, 1, 1], [], []>} : vector<8x8xbf16>, vector<8x32xbf16>, vector<8x32xf32> -> vector<8x32xf32>
    %115 = arith.addf %89, %114 : vector<8x32xf32>
    %c0_45 = arith.constant 0 : index
    %c0_46 = arith.constant 0 : index
    %116 = vector.load %arg5[%c0_45, %c0_46] : memref<1x32xf32, #tpu.memory_space<vmem>>, vector<1x32xf32>
    %117 = vector.broadcast %116 : vector<1x32xf32> to vector<8x32xf32>
    %118 = arith.addf %115, %117 : vector<8x32xf32>
    %119 = arith.addf %1, %118 : vector<8x32xf32>
    %cst_47 = arith.constant dense<0.000000e+00> : vector<8xf32>
    %120 = vector.multi_reduction <add>, %119, %cst_47 [1] : vector<8x32xf32> to vector<8xf32>
    %121 = vector.shape_cast %120 : vector<8xf32> to vector<8x1xf32>
    %cst_48 = arith.constant 3.200000e+01 : f32
    %122 = vector.broadcast %cst_48 : f32 to vector<8x1xf32>
    %123 = arith.divf %121, %122 : vector<8x1xf32>
    %124 = vector.broadcast %123 : vector<8x1xf32> to vector<8x32xf32>
    %125 = arith.subf %119, %124 : vector<8x32xf32>
    %126 = arith.mulf %125, %125 : vector<8x32xf32>
    %cst_49 = arith.constant dense<0.000000e+00> : vector<8xf32>
    %127 = vector.multi_reduction <add>, %126, %cst_49 [1] : vector<8x32xf32> to vector<8xf32>
    %128 = vector.shape_cast %127 : vector<8xf32> to vector<8x1xf32>
    %cst_50 = arith.constant 3.200000e+01 : f32
    %129 = vector.broadcast %cst_50 : f32 to vector<8x1xf32>
    %130 = arith.divf %128, %129 : vector<8x1xf32>
    %131 = vector.broadcast %123 : vector<8x1xf32> to vector<8x32xf32>
    %132 = arith.subf %119, %131 : vector<8x32xf32>
    %cst_51 = arith.constant 9.99999974E-6 : f32
    %133 = vector.broadcast %cst_51 : f32 to vector<8x1xf32>
    %134 = arith.addf %130, %133 : vector<8x1xf32>
    %135 = math.rsqrt %134 : vector<8x1xf32>
    %136 = vector.broadcast %135 : vector<8x1xf32> to vector<8x32xf32>
    %137 = arith.mulf %132, %136 : vector<8x32xf32>
    %c0_52 = arith.constant 0 : index
    %c0_53 = arith.constant 0 : index
    %138 = vector.load %arg6[%c0_52, %c0_53] : memref<1x32xf32, #tpu.memory_space<vmem>>, vector<1x32xf32>
    %139 = vector.broadcast %138 : vector<1x32xf32> to vector<8x32xf32>
    %140 = arith.mulf %137, %139 : vector<8x32xf32>
    %c0_54 = arith.constant 0 : index
    %c0_55 = arith.constant 0 : index
    %141 = vector.load %arg7[%c0_54, %c0_55] : memref<1x32xf32, #tpu.memory_space<vmem>>, vector<1x32xf32>
    %142 = vector.broadcast %141 : vector<1x32xf32> to vector<8x32xf32>
    %143 = arith.addf %140, %142 : vector<8x32xf32>
    %144 = arith.truncf %143 : vector<8x32xf32> to vector<8x32xbf16>
    %c0_56 = arith.constant 0 : index
    %c0_57 = arith.constant 0 : index
    %145 = vector.load %arg8[%c0_56, %c0_57] : memref<32x128xbf16, #tpu.memory_space<vmem>>, vector<32x128xbf16>
    %cst_58 = arith.constant dense<0.000000e+00> : vector<8x128xf32>
    %146 = tpu.matmul %144, %145, %cst_58 {dimension_numbers = #tpu.dot_dimension_numbers<[1], [0], [0], [1], [0, 0, 1, 1], [], []>} : vector<8x32xbf16>, vector<32x128xbf16>, vector<8x128xf32> -> vector<8x128xf32>
    %c0_59 = arith.constant 0 : index
    %c0_60 = arith.constant 0 : index
    %147 = vector.load %arg9[%c0_59, %c0_60] : memref<1x128xf32, #tpu.memory_space<vmem>>, vector<1x128xf32>
    %148 = vector.broadcast %147 : vector<1x128xf32> to vector<8x128xf32>
    %149 = arith.addf %146, %148 : vector<8x128xf32>
    %cst_61 = arith.constant 0.000000e+00 : f32
    %150 = vector.broadcast %cst_61 : f32 to vector<8x128xf32>
    %151 = arith.maximumf %149, %150 : vector<8x128xf32>
    %152 = arith.truncf %151 : vector<8x128xf32> to vector<8x128xbf16>
    %c0_62 = arith.constant 0 : index
    %c0_63 = arith.constant 0 : index
    %153 = vector.load %arg10[%c0_62, %c0_63] : memref<128x32xbf16, #tpu.memory_space<vmem>>, vector<128x32xbf16>
    %cst_64 = arith.constant dense<0.000000e+00> : vector<8x32xf32>
    %154 = tpu.matmul %152, %153, %cst_64 {dimension_numbers = #tpu.dot_dimension_numbers<[1], [0], [0], [1], [0, 0, 1, 1], [], []>} : vector<8x128xbf16>, vector<128x32xbf16>, vector<8x32xf32> -> vector<8x32xf32>
    %c0_65 = arith.constant 0 : index
    %c0_66 = arith.constant 0 : index
    %155 = vector.load %arg11[%c0_65, %c0_66] : memref<1x32xf32, #tpu.memory_space<vmem>>, vector<1x32xf32>
    %156 = vector.broadcast %155 : vector<1x32xf32> to vector<8x32xf32>
    %157 = arith.addf %154, %156 : vector<8x32xf32>
    %158 = arith.addf %143, %157 : vector<8x32xf32>
    %cst_67 = arith.constant dense<0.000000e+00> : vector<8xf32>
    %159 = vector.multi_reduction <add>, %158, %cst_67 [1] : vector<8x32xf32> to vector<8xf32>
    %160 = vector.shape_cast %159 : vector<8xf32> to vector<8x1xf32>
    %cst_68 = arith.constant 3.200000e+01 : f32
    %161 = vector.broadcast %cst_68 : f32 to vector<8x1xf32>
    %162 = arith.divf %160, %161 : vector<8x1xf32>
    %163 = vector.broadcast %162 : vector<8x1xf32> to vector<8x32xf32>
    %164 = arith.subf %158, %163 : vector<8x32xf32>
    %165 = arith.mulf %164, %164 : vector<8x32xf32>
    %cst_69 = arith.constant dense<0.000000e+00> : vector<8xf32>
    %166 = vector.multi_reduction <add>, %165, %cst_69 [1] : vector<8x32xf32> to vector<8xf32>
    %167 = vector.shape_cast %166 : vector<8xf32> to vector<8x1xf32>
    %cst_70 = arith.constant 3.200000e+01 : f32
    %168 = vector.broadcast %cst_70 : f32 to vector<8x1xf32>
    %169 = arith.divf %167, %168 : vector<8x1xf32>
    %170 = vector.broadcast %162 : vector<8x1xf32> to vector<8x32xf32>
    %171 = arith.subf %158, %170 : vector<8x32xf32>
    %cst_71 = arith.constant 9.99999974E-6 : f32
    %172 = vector.broadcast %cst_71 : f32 to vector<8x1xf32>
    %173 = arith.addf %169, %172 : vector<8x1xf32>
    %174 = math.rsqrt %173 : vector<8x1xf32>
    %175 = vector.broadcast %174 : vector<8x1xf32> to vector<8x32xf32>
    %176 = arith.mulf %171, %175 : vector<8x32xf32>
    %c0_72 = arith.constant 0 : index
    %c0_73 = arith.constant 0 : index
    %177 = vector.load %arg12[%c0_72, %c0_73] : memref<1x32xf32, #tpu.memory_space<vmem>>, vector<1x32xf32>
    %178 = vector.broadcast %177 : vector<1x32xf32> to vector<8x32xf32>
    %179 = arith.mulf %176, %178 : vector<8x32xf32>
    %c0_74 = arith.constant 0 : index
    %c0_75 = arith.constant 0 : index
    %180 = vector.load %arg13[%c0_74, %c0_75] : memref<1x32xf32, #tpu.memory_space<vmem>>, vector<1x32xf32>
    %181 = vector.broadcast %180 : vector<1x32xf32> to vector<8x32xf32>
    %182 = arith.addf %179, %181 : vector<8x32xf32>
    %c0_76 = arith.constant 0 : index
    %c0_77 = arith.constant 0 : index
    %c0_78 = arith.constant 0 : index
    %183 = vector.load %arg14[%c0_76, %c0_77, %c0_78] : memref<1x8x32xf32, #tpu.memory_space<vmem>>, vector<1x8x32xf32>
    %184 = vector.shape_cast %183 : vector<1x8x32xf32> to vector<8x32xf32>
    %185 = vector.shape_cast %182 : vector<8x32xf32> to vector<1x8x32xf32>
    tpu.vector_store %arg14[%c0_76, %c0_77, %c0_78], %185 {strides = array<i32>} : memref<1x8x32xf32, #tpu.memory_space<vmem>>, vector<1x8x32xf32>,
    return
  }
  func.func @transform_0(%arg0: i32) -> (i32, i32, i32) {
    %c0_i32 = arith.constant 0 : i32
    %c0_i32_0 = arith.constant 0 : i32
    %c0_i32_1 = arith.constant 0 : i32
    return %arg0, %c0_i32, %c0_i32_0 : i32, i32, i32
  }
  func.func @transform_1(%arg0: i32) -> (i32, i32) {
    %c0_i32 = arith.constant 0 : i32
    %c0_i32_0 = arith.constant 0 : i32
    %c0_i32_1 = arith.constant 0 : i32
    return %c0_i32, %c0_i32_0 : i32, i32
  }
  func.func @transform_2(%arg0: i32) -> (i32, i32) {
    %c0_i32 = arith.constant 0 : i32
    %c0_i32_0 = arith.constant 0 : i32
    %c0_i32_1 = arith.constant 0 : i32
    return %c0_i32, %c0_i32_0 : i32, i32
  }
  func.func @transform_3(%arg0: i32) -> (i32, i32) {
    %c0_i32 = arith.constant 0 : i32
    %c0_i32_0 = arith.constant 0 : i32
    %c0_i32_1 = arith.constant 0 : i32
    return %c0_i32, %c0_i32_0 : i32, i32
  }
  func.func @transform_4(%arg0: i32) -> (i32, i32) {
    %c0_i32 = arith.constant 0 : i32
    %c0_i32_0 = arith.constant 0 : i32
    %c0_i32_1 = arith.constant 0 : i32
    return %c0_i32, %c0_i32_0 : i32, i32
  }
  func.func @transform_5(%arg0: i32) -> (i32, i32) {
    %c0_i32 = arith.constant 0 : i32
    %c0_i32_0 = arith.constant 0 : i32
    %c0_i32_1 = arith.constant 0 : i32
    return %c0_i32, %c0_i32_0 : i32, i32
  }
  func.func @transform_6(%arg0: i32) -> (i32, i32) {
    %c0_i32 = arith.constant 0 : i32
    %c0_i32_0 = arith.constant 0 : i32
    %c0_i32_1 = arith.constant 0 : i32
    return %c0_i32, %c0_i32_0 : i32, i32
  }
  func.func @transform_7(%arg0: i32) -> (i32, i32) {
    %c0_i32 = arith.constant 0 : i32
    %c0_i32_0 = arith.constant 0 : i32
    %c0_i32_1 = arith.constant 0 : i32
    return %c0_i32, %c0_i32_0 : i32, i32
  }
  func.func @transform_8(%arg0: i32) -> (i32, i32) {
    %c0_i32 = arith.constant 0 : i32
    %c0_i32_0 = arith.constant 0 : i32
    %c0_i32_1 = arith.constant 0 : i32
    return %c0_i32, %c0_i32_0 : i32, i32
  }
  func.func @transform_9(%arg0: i32) -> (i32, i32) {
    %c0_i32 = arith.constant 0 : i32
    %c0_i32_0 = arith.constant 0 : i32
    %c0_i32_1 = arith.constant 0 : i32
    return %c0_i32, %c0_i32_0 : i32, i32
  }
  func.func @transform_10(%arg0: i32) -> (i32, i32) {
    %c0_i32 = arith.constant 0 : i32
    %c0_i32_0 = arith.constant 0 : i32
    %c0_i32_1 = arith.constant 0 : i32
    return %c0_i32, %c0_i32_0 : i32, i32
  }
  func.func @transform_11(%arg0: i32) -> (i32, i32) {
    %c0_i32 = arith.constant 0 : i32
    %c0_i32_0 = arith.constant 0 : i32
    %c0_i32_1 = arith.constant 0 : i32
    return %c0_i32, %c0_i32_0 : i32, i32
  }
  func.func @transform_12(%arg0: i32) -> (i32, i32) {
    %c0_i32 = arith.constant 0 : i32
    %c0_i32_0 = arith.constant 0 : i32
    %c0_i32_1 = arith.constant 0 : i32
    return %c0_i32, %c0_i32_0 : i32, i32
  }
  func.func @transform_13(%arg0: i32) -> (i32, i32, i32) {
    %c0_i32 = arith.constant 0 : i32
    %c0_i32_0 = arith.constant 0 : i32
    %c0_i32_1 = arith.constant 0 : i32
    return %arg0, %c0_i32, %c0_i32_0 : i32, i32, i32
  }
  func.func @transform_14(%arg0: i32) -> (i32, i32, i32, i32) {
    %c0_i32 = arith.constant 0 : i32
    %c0_i32_0 = arith.constant 0 : i32
    %c0_i32_1 = arith.constant 0 : i32
    %c0_i32_2 = arith.constant 0 : i32
    return %arg0, %c0_i32, %c0_i32_0, %c0_i32_1 : i32, i32, i32, i32
  }
}

</mosaic_0001>

<bundles_post_ra>
// kernel: tpu_custom_call.1
= control target key start
LH: loop header
LB: loop body
LE: loop exit
PB: predicated region body
PF: predicated region fallthrough
CT: control target
= control target key end

     0   :  { %s1835_s0 = inlined_call_operand.vmem [shape: f32[2,8,32], index: 0, kind: input, shape index: {}]   ;;  %s1836_s1 = inlined_call_operand.vmem [shape: bf16[32,96], index: 1, kind: input, shape index: {}]   ;;  %s1837_s2 = inlined_call_operand.vmem [shape: f32[1,96], index: 2, kind: input, shape index: {}]   ;;  %s1838_s3 = inlined_call_operand.vmem [shape: bf16[32,32], index: 3, kind: input, shape index: {}]   ;;  %s1839_s4 = inlined_call_operand.vmem [shape: f32[1,32], index: 4, kind: input, shape index: {}]   ;;  %s1840_s5 = inlined_call_operand.vmem [shape: f32[1,32], index: 5, kind: input, shape index: {}]   ;;  %s1841_s6 = inlined_call_operand.vmem [shape: f32[1,32], index: 6, kind: input, shape index: {}]   ;;  %s1842_s7 = inlined_call_operand.vmem [shape: bf16[32,128], index: 7, kind: input, shape index: {}]   ;;  %s1843_s8 = inlined_call_operand.vmem [shape: f32[1,128], index: 8, kind: input, shape index: {}]   ;;  %s1844_s9 = inlined_call_operand.vmem [shape: bf16[128,32], index: 9, kind: input, shape index: {}]   ;;  %s1845_s10 = inlined_call_operand.vmem [shape: f32[1,32], index: 10, kind: input, shape index: {}]   ;;  %s1846_s11 = inlined_call_operand.vmem [shape: f32[1,32], index: 11, kind: input, shape index: {}]   ;;  %s1847_s12 = inlined_call_operand.vmem [shape: f32[1,32], index: 12, kind: input, shape index: {}]   ;;  %s1848_s13 = inlined_call_operand.hbm [shape: f32[2,8,32], index: 13, kind: output, shape index: {0}]   ;;  %s1849_s14 = inlined_call_operand.hbm [shape: f32[2,4,8,8], index: 14, kind: output, shape index: {1}]  }
   0x1   :  { %1851 = sst [smem:[#allocation10_spill]] %s1835_s0 }
   0x2   :  { %1852 = sst [smem:[#allocation11_spill]] %s1836_s1 }
   0x3   :  { %1853 = sst [smem:[#allocation12_spill]] %s1837_s2 }
   0x4   :  { %1854 = sst [smem:[#allocation13_spill]] %s1838_s3 }
   0x5   :  { %1855 = sst [smem:[#allocation14_spill]] %s1839_s4 }
   0x6   :  { %1856 = sst [smem:[#allocation15_spill]] %s1840_s5 }
   0x7   :  { %1857 = sst [smem:[#allocation16_spill]] %s1841_s6 }
   0x8   :  { %20 = vsyncpa [#allocation3], 0 }
   0x9   :  { %22 = vsyncpa [#allocation3 + $0x1], 0 }
   0xa   :  { %23 = vsyncpa [#allocation5], 0 }
   0xb   :  { %25 = vsyncpa [#allocation5 + $0x1], 0  ;;  %s1579_s29 = smov 0   ;;  %s1581_s30 = smov 0  }
   0xc   :  { %s1583_s15 = smov 0   ;;  %s1585_s16 = smov 0  }
   0xd LB: > { %1858 = sst [smem:[#allocation8_spill]] %s1484_s15  ;;  %s1600_s17 = sadd.s32 4294967295, %s1488_s16   ;;  %s1488_s16 = sphi %s1585_s16, %s1873_s16   ;;  %s1484_s15 = sphi %s1583_s15, %s1870_s15   ;;  %s1480_s30 = sphi %s1581_s30, %s1872_s30   ;;  %s1476_s29 = sphi %s1579_s29, %s1871_s29  }
   0xe   : > { %s1214_s18 = sadd.s32 4294967294, %s1488_s16   ;;  %s1604_s19 = sadd.s32 1, %s1488_s16  }
   0xf   : > { %s316_s20 = sadd.s32 1, %s1484_s15  ;;  %s313_s21 = ssub.s32 %s1488_s16, %s1604_s19 }
  0x10   : > { %p326_p0 = scmp.ne.s32.totalorder %s1484_s15, %s1480_s30  ;;  %p314_p1 = scmp.eq.s32.totalorder %s313_s21, 0 }
  0x11   : > { %p327_p2 = scmp.eq.s32.totalorder %s1600_s17, 1  ;;  %p332_p3 = scmp.ne.s32.totalorder %s1480_s30, %s1476_s29 }
  0x12   : > { %p333_p4 = scmp.eq.s32.totalorder %s1214_s18, 1  ;;  %p1217_p7 = scmp.ge.s32.totalorder %s1488_s16, 1 }
  0x13   : > { %s1615_s22 = scalar_select %p314_p1, %s1484_s15, %s316_s20  }
  0x14   : > { %p1617_p5 = por %p327_p2, %p326_p0  ;;  %p1621_p6 = por %p333_p4, %p332_p3 }
  0x15   : > { %1859 = sst [smem:[#allocation9_spill]] %s1615_s22  ;;  %p420_p8 = scmp.lt.s32.totalorder %s1488_s16, 3 }
  0x17   : > { %p421_p9 = pnand %p1217_p7, %p420_p8 }
  0x18   : > { %s1862_s1 = sld [smem:[#allocation11_spill]] (!%p421_p9)  ;;  %p470_p10 = scmp.lt.s32.totalorder (!%p421_p9), %s1600_s17, 1 }
  0x19   : > { %424 = sbr.rel (%p421_p9) target bundleno = 2315 (0x90b), region = 72  ;;  %s1863_s0 = sld [smem:[#allocation10_spill]] (!%p421_p9) }
  0x1a   : > { %s1864_s2 = sld [smem:[#allocation12_spill]] (!%p421_p9)  ;;  %s1490_s27 = smov (!%p421_p9), 88  }
  0x1b   : > { %s1491_s22 = smov (!%p421_p9), 96   ;;  %s1493_s28 = smov (!%p421_p9), 80  }
  0x1c   : > { %s1865_s3 = sld [smem:[#allocation13_spill]] (!%p421_p9)  ;;  %s1496_s26 = smov (!%p421_p9), 56  }
  0x1d   : > { %s1499_s25 = smov (!%p421_p9), 48   ;;  %s1866_s4 = sld [smem:[#allocation14_spill]] (!%p421_p9) }
  0x1e   : > { %v1294_v0 = vld [vmem:[%s1862_s1 + $0x8] sm:$0xff]  ;;  %v1293_v1 = vld [vmem:[%s1862_s1] sm:$0xff]  ;;  %s471_s18 = scalar_select %p470_p10, %s1600_s17, 1  ;;  %vm497_vm0 = vcmask 261120   ;;  %vm569_vm1 = vcmask 1043456   ;;  %vm518_vm2 = vcmask 64512  }
  0x1f   : > { %507 = vmatpush.bf16.msra.mxu0 %v1294_v0  ;;  %s1867_s5 = sld [smem:[#allocation15_spill]] }
  0x20   : > { %s1220_s20 = sshll.u32 %s471_s18, 3  ;;  %v1364_v4 = vld [vmem:[%s1864_s2] ss:$0 sm:$0xff]  ;;  %s1494_s18 = smov 72  }
  0x21   : > { %s473_s15 = scalar_lea.vmem %s1863_s0, %s1220_s20  ;;  %s1495_s20 = smov 112  }
  0x22   : > { %v1638_v2 = vld [vmem:[%s473_s15] sm:$0xff]  ;;  %s1492_s15 = smov 120   ;;  %s1868_s6 = sld [smem:[#allocation16_spill]] }
  0x23   : > { %508 = vmatpush.bf16.msra.mxu0 %v1293_v1  ;;  %v476_v3 = vpack.c.bf16 %v1638_v2, %v1638_v2  ;;  %v587_v9 = vld [vmem:[%s1865_s3] sm:$0xf] }
  0x24   : > { %v684_v10 = vsel %vm569_vm1, %v587_v9, 0 }
  0x25   : > { %693 = vmatpush.bf16.msra.mxu1 %v684_v10 }
  0x26   : > { %1229 = vmatmul.msk.bf16.vlgmr.msra.gmra.mxu0 %vm497_vm0, %v476_v3 }
  0xa3   : > { %v510_v5 = vpop.f32.mrf.mxu0 }
  0xa4   : > { %v511_v6 = vadd.f32 %v1364_v4, %v510_v5 }
  0xa6   : > { %v1646_v7 = vpack.c.bf16 %v511_v6, %v511_v6 }
  0xa8   : > { %590 = vrot.lane.b32.xlu2 %v1646_v7, %s1490_s27  ;;  %516 = vrot.lane.b32.xlu0 %v1646_v7, %s1491_s22  ;;  %s1497_s27 = smov 64   ;;  %s1498_s22 = smov 104  }
  0xab   : > { %v512_v8 = vpop.f32.mrf.mxu0 }
  0xb0   : > { %588 = vrot.lane.b32.xlu2 %v1646_v7, %s1492_s15  ;;  %s1679_s15 = sand.u32 1, %s1480_s30  }
  0xb8   : > { %701 = vrot.lane.b32.xlu2 %v1646_v7, %s1493_s28  ;;  %s1219_s28 = sshll.u32 %s1679_s15, 5 }
  0xc0   : > { %794 = vrot.lane.b32.xlu2 %v1646_v7, %s1494_s18  ;;  %s1682_s18 = scalar_lea.vmem [#allocation4], %s1219_s28 }
  0xc8   : > { %699 = vrot.lane.b32.xlu2 %v1646_v7, %s1495_s20  ;;  %s1305_s20 = sshll.u32 %s1600_s17, 5 }
 0x102   : > { %v591_v11 = vpop.permute.xlu2 %590 }
 0x103   : > { %v596_v18 = vsel %vm518_vm2, %v591_v11, 0 }
 0x10a   : > { %v589_v12 = vpop.permute.xlu2 %588 }
 0x112   : > { %v702_v13 = vpop.permute.xlu2 %701 }
 0x113   : > { %v707_v19 = vsel %vm518_vm2, %v702_v13, 0 }
 0x11a   : > { %v795_v14 = vpop.permute.xlu2 %794  ;;  %v517_v15 = vpop.permute.xlu0 %516 }
 0x11b   : > { %v523_v16 = vsel %vm518_vm2, %v517_v15, 0  ;;  %v800_v17 = vsel %vm518_vm2, %v795_v14, 0 }
 0x11c   : > { %532 = vmatpush.bf16.xpose.msra.mxu3 %v523_v16  ;;  %809 = vmatpush.bf16.xpose.msrb.mxu1 %v800_v17 }
 0x122   : > { %v700_v20 = vpop.permute.xlu2 %699 }
 0x123   : > { %1230 = vmatmul.msk.bf16.vlgmr.msra.gmra.mxu3 %vm518_vm2, %v1646_v7 }
 0x124   : > { %605 = vmatpush.bf16.xpose.msrb.mxu3 %v596_v18 }
 0x12c   : > { %716 = vmatpush.bf16.xpose.msra.mxu3 %v707_v19 }
 0x133   : > { %1232 = vmatmul.msk.bf16.vlgmr.msrb.gmra.mxu3 %vm518_vm2, %v589_v12 }
 0x143   : > { %1237 = vmatmul.msk.bf16.vlgmr.msra.gmra.mxu3 %vm518_vm2, %v700_v20 }
 0x1a6   : > { %v534_v21 = vpop.f32.mrf.mxu3 }
 0x1a7   : > { %v538_v22 = vsel %vm518_vm2, %v534_v21, -inf }
 0x1a8   : > { %539 = vmax.xlane.f32.xlu0 %v538_v22 }
 0x1ae   : > { %v536_v23 = vpop.f32.mrf.mxu3 }
 0x1b6   : > { %v607_v24 = vpop.f32.mrf.mxu3 }
 0x1b7   : > { %v611_v25 = vsel %vm518_vm2, %v607_v24, -inf }
 0x1b8   : > { %612 = vmax.xlane.f32.xlu2 %v611_v25  ;;  %v660_v25 = vld [vmem:[%s1865_s3 + $0x4] sm:$0xf] }
 0x1be   : > { %v609_v26 = vpop.f32.mrf.mxu3 }
 0x1bf   : > { %v665_v26 = vsel %vm569_vm1, %v660_v25, 0 }
 0x1c0   : > { %674 = vmatpush.bf16.msrb.mxu0 %v665_v26 }
 0x1c6   : > { %v718_v27 = vpop.f32.mrf.mxu3 }
 0x1c7   : > { %v722_v28 = vsel %vm518_vm2, %v718_v27, -inf }
 0x1c8   : > { %723 = vmax.xlane.f32.xlu0 %v722_v28 }
 0x1ce   : > { %v720_v29 = vpop.f32.mrf.mxu3 }
 0x1d0   : > { %638 = vrot.lane.b32.xlu2 %v1646_v7, %s1496_s26  ;;  %s1500_s26 = smov 40  }
 0x21b   : > { %v540_v30 = vpop.xlane.xlu0 %539 }
 0x21c   : > { %v541_v31 = vsub.f32 %v534_v21, %v540_v30 }
 0x21e   : > { %v542_v32 = vmul.f32 1.442695, %v541_v31 }
 0x220   : > { %1372 = vpow2.f32 %v542_v32 }
 0x226   : > { %v1373_v33 = vpop.eup %1372 }
 0x227   : > { %v544_v34 = vsel %vm518_vm2, %v1373_v33, 0.0 }
 0x228   : > { %545 = vadd.xlane.f32.xlu1 %v544_v34 }
 0x22b   : > { %v613_v35 = vpop.xlane.xlu2 %612 }
 0x22c   : > { %v614_v36 = vsub.f32 %v607_v24, %v613_v35 }
 0x22e   : > { %v615_v37 = vmul.f32 1.442695, %v614_v36 }
 0x230   : > { %1374 = vpow2.f32 %v615_v37 }
 0x233   : > { %v639_v59 = vpop.permute.xlu2 %638 }
 0x234   : > { %v644_v0 = vsel %vm569_vm1, %v639_v59, 0 }
 0x236   : > { %v1375_v38 = vpop.eup %1374 }
 0x237   : > { %v617_v39 = vsel %vm518_vm2, %v1375_v38, 0.0 }
 0x238   : > { %618 = vadd.xlane.f32.xlu0 %v617_v39 }
 0x23b   : > { %v724_v40 = vpop.xlane.xlu0 %723 }
 0x23c   : > { %v725_v41 = vsub.f32 %v718_v27, %v724_v40 }
 0x23e   : > { %v726_v42 = vmul.f32 1.442695, %v725_v41 }
 0x240   : > { %1376 = vpow2.f32 %v726_v42 }
 0x241   : > { %564 = vrot.lane.b32.xlu1 %v1646_v7, %s1497_s27 }
 0x246   : > { %v1673_v43 = vpop.eup %1376 }
 0x247   : > { %v728_v44 = vsel %vm518_vm2, %v1673_v43, 0.0 }
 0x248   : > { %729 = vadd.xlane.f32.xlu0 %v728_v44 }
 0x249   : > { %792 = vrot.lane.b32.xlu1 %v1646_v7, %s1498_s22  ;;  %s1090_s22 = scalar_lea.sflag [#allocation5], %s1679_s15 }
 0x29b   : > { %v546_v45 = vpop.xlane.xlu1 %545 }
 0x29c   : > { %1378 = vrcp.f32 %v546_v45  ;;  %v558_v50 = vand.u32 2147483648, %v546_v45  ;;  %v556_v51 = vand.u32 2147483647, %v546_v45  ;;  %vm552_vm4 = vweird.f32 %v546_v45 }
 0x29e   : > { %v559_v53 = vor.u32 1.1754944e-38, %v558_v50  ;;  %vm557_vm6 = vcmp.eq.f32.partialorder %v556_v51, 8.507059e+37  ;;  %v771_v50 = vld [vmem:[%s1865_s3 + $0x8] sm:$0xf] }
 0x2a2   : > { %v1379_v46 = vpop.eup %1378 }
 0x2a3   : > { %v548_v47 = vmul.f32 %v1379_v46, %v546_v45  ;;  %vm553_vm3 = vweird.f32 %v1379_v46 }
 0x2a4   : > { %vm554_vm5 = vmor %vm552_vm4, %vm553_vm3 }
 0x2a5   : > { %v549_v48 = vsub.f32 1.0, %v548_v47 }
 0x2a7   : > { %v550_v49 = vmul.f32 %v1379_v46, %v549_v48 }
 0x2a9   : > { %v551_v52 = vadd.f32 %v1379_v46, %v550_v49 }
 0x2ab   : > { %v619_v54 = vpop.xlane.xlu0 %618  ;;  %v555_v55 = vsel %vm554_vm5, %v1379_v46, %v551_v52  ;;  %v776_v52 = vsel %vm569_vm1, %v771_v50, 0  ;;  %v1366_v50 = vld [vmem:[%s1867_s5] ss:$0 sm:$0xff] }
 0x2ac   : > { %1380 = vrcp.f32 %v619_v54  ;;  %v560_v56 = vsel %vm557_vm6, %v559_v53, %v555_v55  ;;  %v631_v4 = vand.u32 2147483648, %v619_v54  ;;  %v629_v5 = vand.u32 2147483647, %v619_v54  ;;  %785 = vmatpush.bf16.msra.mxu0 %v776_v52  ;;  %v1367_v52 = vld [vmem:[%s1868_s6] ss:$0 sm:$0xff] }
 0x2ad   : > { %v561_v57 = vmul.f32 %v1373_v33, %v560_v56  ;;  %vm625_vm8 = vweird.f32 %v619_v54 }
 0x2ae   : > { %v632_v9 = vor.u32 1.1754944e-38, %v631_v4  ;;  %vm630_vm10 = vcmp.eq.f32.partialorder %v629_v5, 8.507059e+37 }
 0x2af   : > { %562 = vst.msk [vmem:[%s1682_s18] sm:$0xff] %vm518_vm2, %v561_v57  ;;  %v563_v1 = vpack.c.bf16 %v561_v57, %v561_v57 }
 0x2b2   : > { %v1381_v58 = vpop.eup %1380 }
 0x2b3   : > { %v621_v60 = vmul.f32 %v1381_v58, %v619_v54  ;;  %v565_v61 = vpop.permute.xlu1 %564  ;;  %vm626_vm7 = vweird.f32 %v1381_v58 }
 0x2b4   : > { %v571_v62 = vsel %vm569_vm1, %v565_v61, 0  ;;  %vm627_vm9 = vmor %vm625_vm8, %vm626_vm7 }
 0x2b5   : > { %v622_v63 = vsub.f32 1.0, %v621_v60  ;;  %580 = vmatpush.bf16.msra.mxu2 %v571_v62 }
 0x2b7   : > { %v623_v3 = vmul.f32 %v1381_v58, %v622_v63 }
 0x2b8   : > { %1231 = vmatmul.msk.bf16.vlgmr.msra.gmra.mxu2 %vm518_vm2, %v563_v1 }
 0x2b9   : > { %653 = vmatpush.bf16.msrb.mxu2 %v644_v0  ;;  %v624_v6 = vadd.f32 %v1381_v58, %v623_v3 }
 0x2bb   : > { %v628_v8 = vsel %vm627_vm9, %v1381_v58, %v624_v6  ;;  %v730_v10 = vpop.xlane.xlu0 %729  ;;  %v793_v32 = vpop.permute.xlu1 %792  ;;  %v864_v6 = vld [vmem:[%s1865_s3 + $0xc] sm:$0xf] }
 0x2bc   : > { %1382 = vrcp.f32 %v730_v10  ;;  %v633_v11 = vsel %vm630_vm10, %v632_v9, %v628_v8  ;;  %v742_v16 = vand.u32 2147483648, %v730_v10  ;;  %v740_v19 = vand.u32 2147483647, %v730_v10 }
 0x2bd   : > { %v634_v12 = vmul.f32 %v1375_v38, %v633_v11  ;;  %vm736_vm12 = vweird.f32 %v730_v10  ;;  %v869_v8 = vsel %vm569_vm1, %v864_v6, 0 }
 0x2be   : > { %v743_v21 = vor.u32 1.1754944e-38, %v742_v16  ;;  %vm741_vm14 = vcmp.eq.f32.partialorder %v740_v19, 8.507059e+37 }
 0x2bf   : > { %1233 = vst.msk [vmem:[%s1682_s18 + $0x8] sm:$0xff] %vm518_vm2, %v634_v12  ;;  %v637_v17 = vpack.c.bf16 %v634_v12, %v634_v12 }
 0x2c2   : > { %v1383_v13 = vpop.eup %1382 }
 0x2c3   : > { %v732_v14 = vmul.f32 %v1383_v13, %v730_v10  ;;  %vm737_vm11 = vweird.f32 %v1383_v13 }
 0x2c4   : > { %vm738_vm13 = vmor %vm736_vm12, %vm737_vm11 }
 0x2c5   : > { %v733_v15 = vsub.f32 1.0, %v732_v14 }
 0x2c7   : > { %v734_v18 = vmul.f32 %v1383_v13, %v733_v15  ;;  %v1365_v15 = vld [vmem:[%s1866_s4] ss:$0 sm:$0xff]  ;;  %s1414_s4 = scalar_lea.hbm %s1849_s14, 64 }
 0x2c8   : > { %1234 = vmatmul.msk.bf16.vlgmr.msrb.gmra.mxu2 %vm518_vm2, %v637_v17 }
 0x2c9   : > { %v735_v20 = vadd.f32 %v1383_v13, %v734_v18 }
 0x2cb   : > { %v739_v22 = vsel %vm738_vm13, %v1383_v13, %v735_v20 }
 0x2cc   : > { %v744_v23 = vsel %vm741_vm14, %v743_v21, %v739_v22  ;;  %v1501_v22 = vmov 32.0  }
 0x2cd   : > { %v745_v24 = vmul.f32 %v1673_v43, %v744_v23 }
 0x2cf   : > { %1238 = vst.msk [vmem:[%s1682_s18 + $0x10] sm:$0xff] %vm518_vm2, %v745_v24  ;;  %v748_v49 = vpack.c.bf16 %v745_v24, %v745_v24 }
 0x33b   : > { %v582_v27 = vpop.f32.mrf.mxu2 }
 0x33c   : > { %v586_v28 = vpack.c.bf16 %v582_v27, %v582_v27 }
 0x33e   : > { %1236 = vmatmul.msk.bf16.vlgmr.msra.gmra.mxu1 %vm518_vm2, %v586_v28 }
 0x343   : > { %v584_v29 = vpop.f32.mrf.mxu2 }
 0x34b   : > { %v655_v30 = vpop.f32.mrf.mxu2 }
 0x34c   : > { %v659_v31 = vpack.c.bf16 %v655_v30, %v655_v30 }
 0x34e   : > { %1235 = vmatmul.msk.bf16.vlgmr.msrb.gmra.mxu0 %vm518_vm2, %v659_v31  ;;  %1241 = vmatmul.msk.bf16.vlgmr.msrb.gmra.mxu1 %vm518_vm2, %v793_v32 }
 0x353   : > { %v657_v33 = vpop.f32.mrf.mxu2 }
 0x354   : > { %v1296_v33 = vld [vmem:[%s1842_s7 + $0x8] sm:$0xff] }
 0x355   : > { %960 = vmatpush.bf16.msrb.mxu0 %v1296_v33 }
 0x3bb   : > { %v695_v34 = vpop.f32.mrf.mxu1 }
 0x3c3   : > { %v697_v35 = vpop.f32.mrf.mxu1 }
 0x3c4   : > { %v1304_v35 = vld [vmem:[%s1844_s9 + $0x38] sm:$0xff] }
 0x3c5   : > { %1037 = vmatpush.bf16.msra.mxu1 %v1304_v35 }
 0x3cb   : > { %v676_v36 = vpop.f32.mrf.mxu0  ;;  %v811_v37 = vpop.f32.mrf.mxu1 }
 0x3cc   : > { %v696_v38 = vadd.f32 %v695_v34, %v676_v36  ;;  %v815_v39 = vsel %vm518_vm2, %v811_v37, -inf  ;;  %v1295_v34 = vld [vmem:[%s1842_s7] sm:$0xff] }
 0x3cd   : > { %816 = vmax.xlane.f32.xlu1 %v815_v39  ;;  %961 = vmatpush.bf16.msrb.mxu0 %v1295_v34 }
 0x3d3   : > { %v678_v40 = vpop.f32.mrf.mxu0  ;;  %v813_v41 = vpop.f32.mrf.mxu1 }
 0x3d4   : > { %v1302_v40 = vld [vmem:[%s1844_s9 + $0x28] sm:$0xff]  ;;  %v1301_v41 = vld [vmem:[%s1844_s9 + $0x20] sm:$0xff] }
 0x3e6   : > { %749 = vrot.lane.b32.xlu1 %v1646_v7, %s1499_s25  ;;  %s1115_s25 = scalar_lea.hbm %s1849_s14, %s1305_s20 }
 0x3e7   : > { %s1118_s27 = sshll.u32 %s1115_s25, 4  ;;  %s1119_s27 = int_to_ptr.hbm [resolvable:$true] %s1118_s27 }
 0x3e8   : > { %s1408_s28 = sshra.s32 %s1119_s27, 4  ;;  %s1409_s28 = int_to_ptr.hbm [resolvable:$true] %s1408_s28 }
 0x3e9   : > { %s1410_s1 = scalar_lea.hbm %s1409_s28, 32  ;;  %p1415_p0 = scmp.lt.s32.totalorder %s1409_s28, %s1849_s14 }
 0x3ea   : > { %p1411_p11 = scmp.ne.s32.totalorder %s1409_s28, %s1410_s1  ;;  %p1416_p1 = scmp.lt.s32.totalorder %s1414_s4, %s1410_s1 }
 0x3ec   : > { %p1412_p12 = pnand %p1411_p11, %p1617_p5  ;;  %p1417_p2 = por %p1416_p1, %p1415_p0 }
 0x3ee   : > { %p1413_p13 = pneg %p1412_p12 }
 0x3f0   : > { %p1418_p3 = pnand %p1417_p2, %p1413_p13 }
 0x440   : > { %v817_v42 = vpop.xlane.xlu1 %816 }
 0x441   : > { %v818_v43 = vsub.f32 %v811_v37, %v817_v42 }
 0x443   : > { %v819_v44 = vmul.f32 1.442695, %v818_v43 }
 0x445   : > { %1384 = vpow2.f32 %v819_v44  ;;  %v1300_v44 = vld [vmem:[%s1844_s9 + $0x18] sm:$0xff] }
 0x44b   : > { %v1385_v45 = vpop.eup %1384 }
 0x44c   : > { %v821_v46 = vsel %vm518_vm2, %v1385_v45, 0.0 }
 0x44d   : > { %822 = vadd.xlane.f32.xlu0 %v821_v46 }
 0x458   : > { %v750_v47 = vpop.permute.xlu1 %749 }
 0x459   : > { %v755_v48 = vsel %vm569_vm1, %v750_v47, 0  ;;  %v1299_v47 = vld [vmem:[%s1844_s9 + $0x10] sm:$0xff] }
 0x45a   : > { %764 = vmatpush.bf16.msra.mxu2 %v755_v48 }
 0x45d   : > { %1239 = vmatmul.msk.bf16.vlgmr.msra.gmra.mxu2 %vm518_vm2, %v748_v49 }
 0x45e   : > { %878 = vmatpush.bf16.msrb.mxu2 %v869_v8 }
 0x461   : > { %842 = vrot.lane.b32.xlu0 %v1646_v7, %s1500_s26  ;;  %s1116_s26 = sshll.u32 %s1682_s18, 4  ;;  %s1117_s26 = int_to_ptr.vmem [resolvable:$true] %s1116_s26 }
 0x4c0   : > { %v823_v51 = vpop.xlane.xlu0 %822 }
 0x4c1   : > { %1386 = vrcp.f32 %v823_v51  ;;  %v835_v56 = vand.u32 2147483648, %v823_v51  ;;  %v833_v58 = vand.u32 2147483647, %v823_v51  ;;  %vm829_vm3 = vweird.f32 %v823_v51 }
 0x4c2   : > { %1388 = vrcp.f32 %v1501_v22 }
 0x4c3   : > { %v836_v7 = vor.u32 1.1754944e-38, %v835_v56  ;;  %vm834_vm5 = vcmp.eq.f32.partialorder %v833_v58, 8.507059e+37  ;;  %v1297_v58 = vld [vmem:[%s1844_s9] sm:$0xff] }
 0x4c7   : > { %v1387_v53 = vpop.eup %1386 }
 0x4c8   : > { %v825_v54 = vmul.f32 %v1387_v53, %v823_v51  ;;  %vm830_vm15 = vweird.f32 %v1387_v53  ;;  %v1389_v23 = vpop.eup %1388 }
 0x4c9   : > { %vm831_vm4 = vmor %vm829_vm3, %vm830_vm15  ;;  %v895_v24 = vmul.f32 32.0, %v1389_v23 }
 0x4ca   : > { %v826_v55 = vsub.f32 1.0, %v825_v54 }
 0x4cb   : > { %v896_v25 = vsub.f32 1.0, %v895_v24 }
 0x4cc   : > { %v827_v57 = vmul.f32 %v1387_v53, %v826_v55 }
 0x4cd   : > { %v897_v26 = vmul.f32 %v1389_v23, %v896_v25 }
 0x4ce   : > { %v828_v59 = vadd.f32 %v1387_v53, %v827_v57  ;;  %v1298_v57 = vld [vmem:[%s1844_s9 + $0x8] sm:$0xff] }
 0x4cf   : > { %v898_v27 = vadd.f32 %v1389_v23, %v897_v26 }
 0x4d0   : > { %v832_v60 = vsel %vm831_vm4, %v1387_v53, %v828_v59  ;;  %v1368_v59 = vld [vmem:[%s1843_s8] ss:$0 sm:$0xff] }
 0x4d1   : > { %v837_v61 = vsel %vm834_vm5, %v836_v7, %v832_v60 }
 0x4d2   : > { %v838_v62 = vmul.f32 %v1385_v45, %v837_v61 }
 0x4d3   : > { %v843_v63 = vpop.permute.xlu0 %842 }
 0x4d4   : > { %v848_v0 = vsel %vm569_vm1, %v843_v63, 0  ;;  %1242 = vst.msk [vmem:[%s1682_s18 + $0x18] sm:$0xff] %vm518_vm2, %v838_v62  ;;  %v841_v1 = vpack.c.bf16 %v838_v62, %v838_v62  ;;  %vm899_vm1 = vweird.f32 %v1389_v23 }
 0x4d5   : > { %857 = vmatpush.bf16.msrb.mxu3 %v848_v0  ;;  %v1727_v28 = vsel %vm899_vm1, %v1389_v23, %v898_v27  ;;  %v1369_v0 = vld [vmem:[%s1845_s10] ss:$0 sm:$0xff] }
 0x4d8   : > { %1243 = vmatmul.msk.bf16.vlgmr.msrb.gmra.mxu3 %vm518_vm2, %v841_v1 }
 0x4e0   : > { %v766_v3 = vpop.f32.mrf.mxu2 }
 0x4e1   : > { %v770_v4 = vpack.c.bf16 %v766_v3, %v766_v3 }
 0x4e3   : > { %1240 = vmatmul.msk.bf16.vlgmr.msra.gmra.mxu0 %vm518_vm2, %v770_v4 }
 0x4e8   : > { %v768_v5 = vpop.f32.mrf.mxu2 }
 0x55b   : > { %v859_v9 = vpop.f32.mrf.mxu3 }
 0x55c   : > { %v863_v10 = vpack.c.bf16 %v859_v9, %v859_v9 }
 0x55e   : > { %1244 = vmatmul.msk.bf16.vlgmr.msrb.gmra.mxu2 %vm518_vm2, %v863_v10 }
 0x560   : > { %v787_v11 = vpop.f32.mrf.mxu0 }
 0x561   : > { %v791_v12 = vadd.f32 %v787_v11, %v696_v38  ;;  %v1303_v38 = vld [vmem:[%s1844_s9 + $0x30] sm:$0xff] }
 0x562   : > { %1038 = vmatpush.bf16.msra.mxu1 %v1303_v38 }
 0x563   : > { %v861_v13 = vpop.f32.mrf.mxu3 }
 0x566   : > { %1039 = vmatpush.bf16.msra.mxu1 %v1302_v40 }
 0x568   : > { %v789_v14 = vpop.f32.mrf.mxu0 }
 0x56a   : > { %1040 = vmatpush.bf16.msra.mxu1 %v1301_v41 }
 0x56e   : > { %1041 = vmatpush.bf16.msra.mxu1 %v1300_v44 }
 0x572   : > { %1042 = vmatpush.bf16.msra.mxu1 %v1299_v47 }
 0x576   : > { %1043 = vmatpush.bf16.msra.mxu1 %v1298_v57 }
 0x57a   : > { %1044 = vmatpush.bf16.msra.mxu1 %v1297_v58 }
 0x5e1   : > { %v880_v16 = vpop.f32.mrf.mxu2 }
 0x5e2   : > { %v884_v17 = vadd.f32 %v880_v16, %v791_v12 }
 0x5e4   : > { %v889_v18 = vadd.f32 %v1365_v15, %v884_v17 }
 0x5e6   : > { %v890_v19 = vadd.f32 %v889_v18, %v1638_v2 }
 0x5e8   : > { %v891_v20 = vsel %vm497_vm0, %v890_v19, 0.0 }
 0x5e9   : > { %892 = vadd.xlane.f32.xlu0 %v891_v20  ;;  %v882_v21 = vpop.f32.mrf.mxu2 }
 0x65c   : > { %v893_v29 = vpop.xlane.xlu0 %892 }
 0x65d   : > { %v901_v30 = vmul.f32 %v1727_v28, %v893_v29 }
 0x65f   : > { %v902_v31 = vsub.f32 %v890_v19, %v901_v30 }
 0x661   : > { %v903_v32 = vmul.f32 %v902_v31, %v902_v31 }
 0x663   : > { %v904_v2 = vsel %vm497_vm0, %v903_v32, 0.0 }
 0x664   : > { %905 = vadd.xlane.f32.xlu2 %v904_v2 }
 0x6d7   : > { %v906_v36 = vpop.xlane.xlu2 %905 }
 0x6d8   : > { %v907_v37 = vmul.f32 %v906_v36, %v1727_v28 }
 0x6da   : > { %v908_v39 = vadd.f32 1e-05, %v907_v37 }
 0x6dc   : > { %1390 = vrsqrt.f32 %v908_v39  ;;  %vm915_vm6 = vweird.f32 %v908_v39 }
 0x6e2   : > { %v1391_v42 = vpop.eup %1390 }
 0x6e3   : > { %v910_v43 = vmul.f32 %v1391_v42, %v908_v39  ;;  %vm916_vm2 = vweird.f32 %v1391_v42 }
 0x6e4   : > { %vm917_vm7 = vmor %vm915_vm6, %vm916_vm2 }
 0x6e5   : > { %v911_v45 = vmul.f32 %v1391_v42, %v910_v43 }
 0x6e7   : > { %v912_v46 = vmul.f32 0.5, %v911_v45 }
 0x6e9   : > { %v913_v48 = vsub.f32 1.5, %v912_v46 }
 0x6eb   : > { %v914_v49 = vmul.f32 %v1391_v42, %v913_v48 }
 0x6ed   : > { %v918_v51 = vsel %vm917_vm7, %v1391_v42, %v914_v49 }
 0x6ee   : > { %v919_v53 = vmul.f32 %v918_v51, %v902_v31 }
 0x6f0   : > { %v924_v54 = vmul.f32 %v1366_v50, %v919_v53 }
 0x6f2   : > { %v929_v55 = vadd.f32 %v1367_v52, %v924_v54 }
 0x6f4   : > { %v930_v56 = vpack.c.bf16 %v929_v55, %v929_v55 }
 0x6f6   : > { %1253 = vmatmul.msk.bf16.vlgmr.msrb.gmra.mxu0 %vm497_vm0, %v930_v56 }
 0x773   : > { %v963_v7 = vpop.f32.mrf.mxu0 }
 0x774   : > { %v964_v60 = vadd.f32 %v1368_v59, %v963_v7 }
 0x776   : > { %v967_v61 = vmax.f32 %v964_v60, 0.0 }
 0x778   : > { %v968_v62 = vpack.c.bf16 %v967_v61, %v967_v61 }
 0x77a   : > { %1045 = vmatmul.bf16.vlgmr.msra.gmra.mxu1 %v968_v62 }
 0x77b   : > { %v965_v63 = vpop.f32.mrf.mxu0 }
 0x7f7   : > { %v1046_v1 = vpop.f32.mrf.mxu1 }
 0x7f8   : > { %v1047_v3 = vadd.f32 %v1369_v0, %v1046_v1 }
 0x7fa   : > { %v1050_v4 = vadd.f32 %v1047_v3, %v929_v55 }
 0x7fc   : > { %v1051_v5 = vsel %vm497_vm0, %v1050_v4, 0.0 }
 0x7fd   : > { %1052 = vadd.xlane.f32.xlu1 %v1051_v5 }
 0x7ff   : > { %v1048_v6 = vpop.f32.mrf.mxu1 }
 0x870   : > { %v1053_v8 = vpop.xlane.xlu1 %1052 }
 0x871   : > { %v1054_v9 = vmul.f32 %v1053_v8, %v1727_v28 }
 0x873   : > { %v1055_v10 = vsub.f32 %v1050_v4, %v1054_v9 }
 0x875   : > { %v1056_v11 = vmul.f32 %v1055_v10, %v1055_v10 }
 0x877   : > { %v1057_v12 = vsel %vm497_vm0, %v1056_v11, 0.0 }
 0x878   : > { %1058 = vadd.xlane.f32.xlu0 %v1057_v12 }
 0x879   : > { %1421 = shalt.err (!%p1418_p3)
}
 0x87a   : > { %s1502_s18 = smov 128   ;;  %s1503_s20 = smov 8   ;;  %v1370_v22 = vld [vmem:[%s1846_s11] ss:$0 sm:$0xff] }
 0x87b   : > { %1307 = dma.vmem_to_hbm [thread:$0]  (%p1617_p5), %s1117_s26, 512, %s1119_s27, %s1090_s22, %s1502_s18, %s1502_s18, %s1503_s20  }
 0x87c   : > { %s1218_s1 = sshll.u32 %s1679_s15, 3  ;;  %s1288_s2 = sshll.u32 %s1600_s17, 3  ;;  %v1371_v25 = vld [vmem:[%s1847_s12] ss:$0 sm:$0xff] }
 0x87d   : > { %s1100_s21 = scalar_lea.hbm %s1848_s13, %s1288_s2  ;;  %s462_s17 = scalar_lea.vmem [#allocation2], %s1218_s1 }
 0x87e   : > { %s1102_s26 = sshll.u32 %s462_s17, 4  ;;  %s1104_s27 = sshll.u32 %s1100_s21, 4  ;;  %s1103_s26 = int_to_ptr.vmem [resolvable:$true] %s1102_s26  ;;  %s1105_s27 = int_to_ptr.hbm [resolvable:$true] %s1104_s27 }
 0x87f   : > { %s1085_s22 = scalar_lea.sflag [#allocation3], %s1679_s15  ;;  %s1436_s28 = sshra.s32 %s1105_s27, 4  ;;  %s1437_s28 = int_to_ptr.hbm [resolvable:$true] %s1436_s28 }
 0x880   : > { %s1438_s18 = scalar_lea.hbm %s1437_s28, 8  ;;  %s1442_s1 = scalar_lea.hbm %s1848_s13, 16 }
 0x881   : > { %p1439_p4 = scmp.ne.s32.totalorder %s1437_s28, %s1438_s18  ;;  %p1443_p9 = scmp.lt.s32.totalorder %s1437_s28, %s1848_s13 }
 0x882   : > { %p1444_p10 = scmp.lt.s32.totalorder %s1442_s1, %s1438_s18 }
 0x883   : > { %p1440_p7 = pnand %p1439_p4, %p1617_p5 }
 0x884   : > { %p1445_p11 = por %p1444_p10, %p1443_p9 }
 0x885   : > { %p1441_p8 = pneg %p1440_p7 }
 0x887   : > { %p1446_p12 = pnand %p1445_p11, %p1441_p8 }
 0x8eb   : > { %v1059_v13 = vpop.xlane.xlu0 %1058 }
 0x8ec   : > { %v1060_v14 = vmul.f32 %v1059_v13, %v1727_v28 }
 0x8ee   : > { %v1061_v15 = vadd.f32 1e-05, %v1060_v14 }
 0x8f0   : > { %1392 = vrsqrt.f32 %v1061_v15  ;;  %vm1068_vm9 = vweird.f32 %v1061_v15 }
 0x8f6   : > { %v1393_v16 = vpop.eup %1392 }
 0x8f7   : > { %v1063_v17 = vmul.f32 %v1393_v16, %v1061_v15  ;;  %vm1069_vm8 = vweird.f32 %v1393_v16 }
 0x8f8   : > { %vm1070_vm10 = vmor %vm1068_vm9, %vm1069_vm8 }
 0x8f9   : > { %v1064_v18 = vmul.f32 %v1393_v16, %v1063_v17 }
 0x8fb   : > { %v1065_v19 = vmul.f32 0.5, %v1064_v18 }
 0x8fd   : > { %v1066_v20 = vsub.f32 1.5, %v1065_v19 }
 0x8ff   : > { %v1067_v21 = vmul.f32 %v1393_v16, %v1066_v20 }
 0x901   : > { %v1071_v23 = vsel %vm1070_vm10, %v1393_v16, %v1067_v21 }
 0x902   : > { %v1072_v24 = vmul.f32 %v1071_v23, %v1055_v10 }
 0x904   : > { %v1077_v26 = vmul.f32 %v1370_v22, %v1072_v24 }
 0x906   : > { %v1082_v27 = vadd.f32 %v1371_v25, %v1077_v26 }
 0x908   : > { %1083 = vst.msk [vmem:[%s462_s17] sm:$0xff] %vm497_vm0, %v1082_v27 }
 0x909   : > { %1449 = shalt.err (!%p1446_p12)
}
 0x90a   : > { %1306 = dma.vmem_to_hbm [thread:$0]  (%p1617_p5), %s1103_s26, 128, %s1105_s27, %s1085_s22  }
 0x90b PF: > { %p1317_p13 = scmp.ge.s32.totalorder %s1488_s16, 2  ;;  %s1133_s15 = sand.u32 1, %s1476_s29  }
 0x90c   : > { %s1134_s5 = scalar_lea.sflag [#allocation3], %s1133_s15 }
 0x90d   : > { %p1311_p0 = pnand %p1317_p13, %p1621_p6 }
 0x90f   : > { %p1312_p1 = pneg %p1311_p0 }
 0x911   : > { %1467 = dma.done.wait (%p1312_p1), %s1134_s5, 128  }
 0x912   : > { %1469 = vsyncadd (%p1312_p1), %s1134_s5, 4294967168  ;;  %s1144_s6 = scalar_lea.sflag [#allocation5], %s1133_s15 }
 0x913   : > { %1471 = dma.done.wait (%p1312_p1), %s1144_s6, 512  }
 0x914   : > { %1473 = vsyncadd (%p1312_p1), %s1144_s6, 4294966784  ;;  %s1869_s21 = sld [smem:[#allocation8_spill]]  ;;  %p28_p5 = scmp.ge.s32.totalorder %s1604_s19, 4  }
 0x915   : > { %s1870_s15 = sld [smem:[#allocation9_spill]]  ;;  %s1871_s29 = smov %s1480_s30 }
 0x916   : > { %s1873_s16 = smov %s1604_s19  ;;  %30 = sbr.rel (!%p28_p5) target bundleno = 13 (0xd), region = 127 }
 0x91a   : > { %s1872_s30 = smov %s1869_s21 }
 0x91b   :  { %1150 = vsyncpa [#allocation3], 1 }
 0x91c   :  { %1152 = vsyncpa [#allocation3 + $0x1], 1 }
 0x91d   :  { %1153 = vsyncpa [#allocation5], 1 }
 0x91e   :  { %1155 = vsyncpa [#allocation5 + $0x1], 1 }

// kernel: tpu_custom_call.1
= control target key start
LH: loop header
LB: loop body
LE: loop exit
PB: predicated region body
PF: predicated region fallthrough
CT: control target
= control target key end

     0   :  { %s1835_s0 = inlined_call_operand.vmem [shape: f32[2,8,32], index: 0, kind: input, shape index: {}]   ;;  %s1836_s1 = inlined_call_operand.vmem [shape: bf16[32,96], index: 1, kind: input, shape index: {}]   ;;  %s1837_s2 = inlined_call_operand.vmem [shape: f32[1,96], index: 2, kind: input, shape index: {}]   ;;  %s1838_s3 = inlined_call_operand.vmem [shape: bf16[32,32], index: 3, kind: input, shape index: {}]   ;;  %s1839_s4 = inlined_call_operand.vmem [shape: f32[1,32], index: 4, kind: input, shape index: {}]   ;;  %s1840_s5 = inlined_call_operand.vmem [shape: f32[1,32], index: 5, kind: input, shape index: {}]   ;;  %s1841_s6 = inlined_call_operand.vmem [shape: f32[1,32], index: 6, kind: input, shape index: {}]   ;;  %s1842_s7 = inlined_call_operand.vmem [shape: bf16[32,128], index: 7, kind: input, shape index: {}]   ;;  %s1843_s8 = inlined_call_operand.vmem [shape: f32[1,128], index: 8, kind: input, shape index: {}]   ;;  %s1844_s9 = inlined_call_operand.vmem [shape: bf16[128,32], index: 9, kind: input, shape index: {}]   ;;  %s1845_s10 = inlined_call_operand.vmem [shape: f32[1,32], index: 10, kind: input, shape index: {}]   ;;  %s1846_s11 = inlined_call_operand.vmem [shape: f32[1,32], index: 11, kind: input, shape index: {}]   ;;  %s1847_s12 = inlined_call_operand.vmem [shape: f32[1,32], index: 12, kind: input, shape index: {}]   ;;  %s1848_s13 = inlined_call_operand.hbm [shape: f32[2,8,32], index: 13, kind: output, shape index: {0}]   ;;  %s1849_s14 = inlined_call_operand.hbm [shape: f32[2,4,8,8], index: 14, kind: output, shape index: {1}]  }
   0x1   :  { %1851 = sst [smem:[#allocation10_spill]] %s1835_s0 }
   0x2   :  { %1852 = sst [smem:[#allocation11_spill]] %s1836_s1 }
   0x3   :  { %1853 = sst [smem:[#allocation12_spill]] %s1837_s2 }
   0x4   :  { %1854 = sst [smem:[#allocation13_spill]] %s1838_s3 }
   0x5   :  { %1855 = sst [smem:[#allocation14_spill]] %s1839_s4 }
   0x6   :  { %1856 = sst [smem:[#allocation15_spill]] %s1840_s5 }
   0x7   :  { %1857 = sst [smem:[#allocation16_spill]] %s1841_s6 }
   0x8   :  { %20 = vsyncpa [#allocation3], 0 }
   0x9   :  { %22 = vsyncpa [#allocation3 + $0x1], 0 }
   0xa   :  { %23 = vsyncpa [#allocation5], 0 }
   0xb   :  { %25 = vsyncpa [#allocation5 + $0x1], 0  ;;  %s1579_s29 = smov 0   ;;  %s1581_s30 = smov 0  }
   0xc   :  { %s1583_s15 = smov 0   ;;  %s1585_s16 = smov 0  }
   0xd LB: > { %1858 = sst [smem:[#allocation8_spill]] %s1484_s15  ;;  %s1600_s17 = sadd.s32 4294967295, %s1488_s16   ;;  %s1488_s16 = sphi %s1585_s16, %s1873_s16   ;;  %s1484_s15 = sphi %s1583_s15, %s1870_s15   ;;  %s1480_s30 = sphi %s1581_s30, %s1872_s30   ;;  %s1476_s29 = sphi %s1579_s29, %s1871_s29  }
   0xe   : > { %s1214_s18 = sadd.s32 4294967294, %s1488_s16   ;;  %s1604_s19 = sadd.s32 1, %s1488_s16  }
   0xf   : > { %s316_s20 = sadd.s32 1, %s1484_s15  ;;  %s313_s21 = ssub.s32 %s1488_s16, %s1604_s19 }
  0x10   : > { %p326_p0 = scmp.ne.s32.totalorder %s1484_s15, %s1480_s30  ;;  %p314_p1 = scmp.eq.s32.totalorder %s313_s21, 0 }
  0x11   : > { %p327_p2 = scmp.eq.s32.totalorder %s1600_s17, 1  ;;  %p332_p3 = scmp.ne.s32.totalorder %s1480_s30, %s1476_s29 }
  0x12   : > { %p333_p4 = scmp.eq.s32.totalorder %s1214_s18, 1  ;;  %p1217_p7 = scmp.ge.s32.totalorder %s1488_s16, 1 }
  0x13   : > { %s1615_s22 = scalar_select %p314_p1, %s1484_s15, %s316_s20  }
  0x14   : > { %p1617_p5 = por %p327_p2, %p326_p0  ;;  %p1621_p6 = por %p333_p4, %p332_p3 }
  0x15   : > { %1859 = sst [smem:[#allocation9_spill]] %s1615_s22  ;;  %p420_p8 = scmp.lt.s32.totalorder %s1488_s16, 3 }
  0x17   : > { %p421_p9 = pnand %p1217_p7, %p420_p8 }
  0x18   : > { %s1862_s1 = sld [smem:[#allocation11_spill]] (!%p421_p9)  ;;  %p470_p10 = scmp.lt.s32.totalorder (!%p421_p9), %s1600_s17, 1 }
  0x19   : > { %424 = sbr.rel (%p421_p9) target bundleno = 2315 (0x90b), region = 72  ;;  %s1863_s0 = sld [smem:[#allocation10_spill]] (!%p421_p9) }
  0x1a   : > { %s1864_s2 = sld [smem:[#allocation12_spill]] (!%p421_p9)  ;;  %s1490_s27 = smov (!%p421_p9), 88  }
  0x1b   : > { %s1491_s22 = smov (!%p421_p9), 96   ;;  %s1493_s28 = smov (!%p421_p9), 80  }
  0x1c   : > { %s1865_s3 = sld [smem:[#allocation13_spill]] (!%p421_p9)  ;;  %s1496_s26 = smov (!%p421_p9), 56  }
  0x1d   : > { %s1499_s25 = smov (!%p421_p9), 48   ;;  %s1866_s4 = sld [smem:[#allocation14_spill]] (!%p421_p9) }
  0x1e   : > { %v1294_v0 = vld [vmem:[%s1862_s1 + $0x8] sm:$0xff]  ;;  %v1293_v1 = vld [vmem:[%s1862_s1] sm:$0xff]  ;;  %s471_s18 = scalar_select %p470_p10, %s1600_s17, 1  ;;  %vm497_vm0 = vcmask 261120   ;;  %vm569_vm1 = vcmask 1043456   ;;  %vm518_vm2 = vcmask 64512  }
  0x1f   : > { %507 = vmatpush.bf16.msra.mxu0 %v1294_v0  ;;  %s1867_s5 = sld [smem:[#allocation15_spill]] }
  0x20   : > { %s1220_s20 = sshll.u32 %s471_s18, 3  ;;  %v1364_v4 = vld [vmem:[%s1864_s2] ss:$0 sm:$0xff]  ;;  %s1494_s18 = smov 72  }
  0x21   : > { %s473_s15 = scalar_lea.vmem %s1863_s0, %s1220_s20  ;;  %s1495_s20 = smov 112  }
  0x22   : > { %v1638_v2 = vld [vmem:[%s473_s15] sm:$0xff]  ;;  %s1492_s15 = smov 120   ;;  %s1868_s6 = sld [smem:[#allocation16_spill]] }
  0x23   : > { %508 = vmatpush.bf16.msra.mxu0 %v1293_v1  ;;  %v476_v3 = vpack.c.bf16 %v1638_v2, %v1638_v2  ;;  %v587_v9 = vld [vmem:[%s1865_s3] sm:$0xf] }
  0x24   : > { %v684_v10 = vsel %vm569_vm1, %v587_v9, 0 }
  0x25   : > { %693 = vmatpush.bf16.msra.mxu1 %v684_v10 }
  0x26   : > { %1229 = vmatmul.msk.bf16.vlgmr.msra.gmra.mxu0 %vm497_vm0, %v476_v3 }
  0xa3   : > { %v510_v5 = vpop.f32.mrf.mxu0 }
  0xa4   : > { %v511_v6 = vadd.f32 %v1364_v4, %v510_v5 }
  0xa6   : > { %v1646_v7 = vpack.c.bf16 %v511_v6, %v511_v6 }
  0xa8   : > { %590 = vrot.lane.b32.xlu2 %v1646_v7, %s1490_s27  ;;  %516 = vrot.lane.b32.xlu0 %v1646_v7, %s1491_s22  ;;  %s1497_s27 = smov 64   ;;  %s1498_s22 = smov 104  }
  0xab   : > { %v512_v8 = vpop.f32.mrf.mxu0 }
  0xb0   : > { %588 = vrot.lane.b32.xlu2 %v1646_v7, %s1492_s15  ;;  %s1679_s15 = sand.u32 1, %s1480_s30  }
  0xb8   : > { %701 = vrot.lane.b32.xlu2 %v1646_v7, %s1493_s28  ;;  %s1219_s28 = sshll.u32 %s1679_s15, 5 }
  0xc0   : > { %794 = vrot.lane.b32.xlu2 %v1646_v7, %s1494_s18  ;;  %s1682_s18 = scalar_lea.vmem [#allocation4], %s1219_s28 }
  0xc8   : > { %699 = vrot.lane.b32.xlu2 %v1646_v7, %s1495_s20  ;;  %s1305_s20 = sshll.u32 %s1600_s17, 5 }
 0x102   : > { %v591_v11 = vpop.permute.xlu2 %590 }
 0x103   : > { %v596_v18 = vsel %vm518_vm2, %v591_v11, 0 }
 0x10a   : > { %v589_v12 = vpop.permute.xlu2 %588 }
 0x112   : > { %v702_v13 = vpop.permute.xlu2 %701 }
 0x113   : > { %v707_v19 = vsel %vm518_vm2, %v702_v13, 0 }
 0x11a   : > { %v795_v14 = vpop.permute.xlu2 %794  ;;  %v517_v15 = vpop.permute.xlu0 %516 }
 0x11b   : > { %v523_v16 = vsel %vm518_vm2, %v517_v15, 0  ;;  %v800_v17 = vsel %vm518_vm2, %v795_v14, 0 }
 0x11c   : > { %532 = vmatpush.bf16.xpose.msra.mxu3 %v523_v16  ;;  %809 = vmatpush.bf16.xpose.msrb.mxu1 %v800_v17 }
 0x122   : > { %v700_v20 = vpop.permute.xlu2 %699 }
 0x123   : > { %1230 = vmatmul.msk.bf16.vlgmr.msra.gmra.mxu3 %vm518_vm2, %v1646_v7 }
 0x124   : > { %605 = vmatpush.bf16.xpose.msrb.mxu3 %v596_v18 }
 0x12c   : > { %716 = vmatpush.bf16.xpose.msra.mxu3 %v707_v19 }
 0x133   : > { %1232 = vmatmul.msk.bf16.vlgmr.msrb.gmra.mxu3 %vm518_vm2, %v589_v12 }
 0x143   : > { %1237 = vmatmul.msk.bf16.vlgmr.msra.gmra.mxu3 %vm518_vm2, %v700_v20 }
 0x1a6   : > { %v534_v21 = vpop.f32.mrf.mxu3 }
 0x1a7   : > { %v538_v22 = vsel %vm518_vm2, %v534_v21, -inf }
 0x1a8   : > { %539 = vmax.xlane.f32.xlu0 %v538_v22 }
 0x1ae   : > { %v536_v23 = vpop.f32.mrf.mxu3 }
 0x1b6   : > { %v607_v24 = vpop.f32.mrf.mxu3 }
 0x1b7   : > { %v611_v25 = vsel %vm518_vm2, %v607_v24, -inf }
 0x1b8   : > { %612 = vmax.xlane.f32.xlu2 %v611_v25  ;;  %v660_v25 = vld [vmem:[%s1865_s3 + $0x4] sm:$0xf] }
 0x1be   : > { %v609_v26 = vpop.f32.mrf.mxu3 }
 0x1bf   : > { %v665_v26 = vsel %vm569_vm1, %v660_v25, 0 }
 0x1c0   : > { %674 = vmatpush.bf16.msrb.mxu0 %v665_v26 }
 0x1c6   : > { %v718_v27 = vpop.f32.mrf.mxu3 }
 0x1c7   : > { %v722_v28 = vsel %vm518_vm2, %v718_v27, -inf }
 0x1c8   : > { %723 = vmax.xlane.f32.xlu0 %v722_v28 }
 0x1ce   : > { %v720_v29 = vpop.f32.mrf.mxu3 }
 0x1d0   : > { %638 = vrot.lane.b32.xlu2 %v1646_v7, %s1496_s26  ;;  %s1500_s26 = smov 40  }
 0x21b   : > { %v540_v30 = vpop.xlane.xlu0 %539 }
 0x21c   : > { %v541_v31 = vsub.f32 %v534_v21, %v540_v30 }
 0x21e   : > { %v542_v32 = vmul.f32 1.442695, %v541_v31 }
 0x220   : > { %1372 = vpow2.f32 %v542_v32 }
 0x226   : > { %v1373_v33 = vpop.eup %1372 }
 0x227   : > { %v544_v34 = vsel %vm518_vm2, %v1373_v33, 0.0 }
 0x228   : > { %545 = vadd.xlane.f32.xlu1 %v544_v34 }
 0x22b   : > { %v613_v35 = vpop.xlane.xlu2 %612 }
 0x22c   : > { %v614_v36 = vsub.f32 %v607_v24, %v613_v35 }
 0x22e   : > { %v615_v37 = vmul.f32 1.442695, %v614_v36 }
 0x230   : > { %1374 = vpow2.f32 %v615_v37 }
 0x233   : > { %v639_v59 = vpop.permute.xlu2 %638 }
 0x234   : > { %v644_v0 = vsel %vm569_vm1, %v639_v59, 0 }
 0x236   : > { %v1375_v38 = vpop.eup %1374 }
 0x237   : > { %v617_v39 = vsel %vm518_vm2, %v1375_v38, 0.0 }
 0x238   : > { %618 = vadd.xlane.f32.xlu0 %v617_v39 }
 0x23b   : > { %v724_v40 = vpop.xlane.xlu0 %723 }
 0x23c   : > { %v725_v41 = vsub.f32 %v718_v27, %v724_v40 }
 0x23e   : > { %v726_v42 = vmul.f32 1.442695, %v725_v41 }
 0x240   : > { %1376 = vpow2.f32 %v726_v42 }
 0x241   : > { %564 = vrot.lane.b32.xlu1 %v1646_v7, %s1497_s27 }
 0x246   : > { %v1673_v43 = vpop.eup %1376 }
 0x247   : > { %v728_v44 = vsel %vm518_vm2, %v1673_v43, 0.0 }
 0x248   : > { %729 = vadd.xlane.f32.xlu0 %v728_v44 }
 0x249   : > { %792 = vrot.lane.b32.xlu1 %v1646_v7, %s1498_s22  ;;  %s1090_s22 = scalar_lea.sflag [#allocation5], %s1679_s15 }
 0x29b   : > { %v546_v45 = vpop.xlane.xlu1 %545 }
 0x29c   : > { %1378 = vrcp.f32 %v546_v45  ;;  %v558_v50 = vand.u32 2147483648, %v546_v45  ;;  %v556_v51 = vand.u32 2147483647, %v546_v45  ;;  %vm552_vm4 = vweird.f32 %v546_v45 }
 0x29e   : > { %v559_v53 = vor.u32 1.1754944e-38, %v558_v50  ;;  %vm557_vm6 = vcmp.eq.f32.partialorder %v556_v51, 8.507059e+37  ;;  %v771_v50 = vld [vmem:[%s1865_s3 + $0x8] sm:$0xf] }
 0x2a2   : > { %v1379_v46 = vpop.eup %1378 }
 0x2a3   : > { %v548_v47 = vmul.f32 %v1379_v46, %v546_v45  ;;  %vm553_vm3 = vweird.f32 %v1379_v46 }
 0x2a4   : > { %vm554_vm5 = vmor %vm552_vm4, %vm553_vm3 }
 0x2a5   : > { %v549_v48 = vsub.f32 1.0, %v548_v47 }
 0x2a7   : > { %v550_v49 = vmul.f32 %v1379_v46, %v549_v48 }
 0x2a9   : > { %v551_v52 = vadd.f32 %v1379_v46, %v550_v49 }
 0x2ab   : > { %v619_v54 = vpop.xlane.xlu0 %618  ;;  %v555_v55 = vsel %vm554_vm5, %v1379_v46, %v551_v52  ;;  %v776_v52 = vsel %vm569_vm1, %v771_v50, 0  ;;  %v1366_v50 = vld [vmem:[%s1867_s5] ss:$0 sm:$0xff] }
 0x2ac   : > { %1380 = vrcp.f32 %v619_v54  ;;  %v560_v56 = vsel %vm557_vm6, %v559_v53, %v555_v55  ;;  %v631_v4 = vand.u32 2147483648, %v619_v54  ;;  %v629_v5 = vand.u32 2147483647, %v619_v54  ;;  %785 = vmatpush.bf16.msra.mxu0 %v776_v52  ;;  %v1367_v52 = vld [vmem:[%s1868_s6] ss:$0 sm:$0xff] }
 0x2ad   : > { %v561_v57 = vmul.f32 %v1373_v33, %v560_v56  ;;  %vm625_vm8 = vweird.f32 %v619_v54 }
 0x2ae   : > { %v632_v9 = vor.u32 1.1754944e-38, %v631_v4  ;;  %vm630_vm10 = vcmp.eq.f32.partialorder %v629_v5, 8.507059e+37 }
 0x2af   : > { %562 = vst.msk [vmem:[%s1682_s18] sm:$0xff] %vm518_vm2, %v561_v57  ;;  %v563_v1 = vpack.c.bf16 %v561_v57, %v561_v57 }
 0x2b2   : > { %v1381_v58 = vpop.eup %1380 }
 0x2b3   : > { %v621_v60 = vmul.f32 %v1381_v58, %v619_v54  ;;  %v565_v61 = vpop.permute.xlu1 %564  ;;  %vm626_vm7 = vweird.f32 %v1381_v58 }
 0x2b4   : > { %v571_v62 = vsel %vm569_vm1, %v565_v61, 0  ;;  %vm627_vm9 = vmor %vm625_vm8, %vm626_vm7 }
 0x2b5   : > { %v622_v63 = vsub.f32 1.0, %v621_v60  ;;  %580 = vmatpush.bf16.msra.mxu2 %v571_v62 }
 0x2b7   : > { %v623_v3 = vmul.f32 %v1381_v58, %v622_v63 }
 0x2b8   : > { %1231 = vmatmul.msk.bf16.vlgmr.msra.gmra.mxu2 %vm518_vm2, %v563_v1 }
 0x2b9   : > { %653 = vmatpush.bf16.msrb.mxu2 %v644_v0  ;;  %v624_v6 = vadd.f32 %v1381_v58, %v623_v3 }
 0x2bb   : > { %v628_v8 = vsel %vm627_vm9, %v1381_v58, %v624_v6  ;;  %v730_v10 = vpop.xlane.xlu0 %729  ;;  %v793_v32 = vpop.permute.xlu1 %792  ;;  %v864_v6 = vld [vmem:[%s1865_s3 + $0xc] sm:$0xf] }
 0x2bc   : > { %1382 = vrcp.f32 %v730_v10  ;;  %v633_v11 = vsel %vm630_vm10, %v632_v9, %v628_v8  ;;  %v742_v16 = vand.u32 2147483648, %v730_v10  ;;  %v740_v19 = vand.u32 2147483647, %v730_v10 }
 0x2bd   : > { %v634_v12 = vmul.f32 %v1375_v38, %v633_v11  ;;  %vm736_vm12 = vweird.f32 %v730_v10  ;;  %v869_v8 = vsel %vm569_vm1, %v864_v6, 0 }
 0x2be   : > { %v743_v21 = vor.u32 1.1754944e-38, %v742_v16  ;;  %vm741_vm14 = vcmp.eq.f32.partialorder %v740_v19, 8.507059e+37 }
 0x2bf   : > { %1233 = vst.msk [vmem:[%s1682_s18 + $0x8] sm:$0xff] %vm518_vm2, %v634_v12  ;;  %v637_v17 = vpack.c.bf16 %v634_v12, %v634_v12 }
 0x2c2   : > { %v1383_v13 = vpop.eup %1382 }
 0x2c3   : > { %v732_v14 = vmul.f32 %v1383_v13, %v730_v10  ;;  %vm737_vm11 = vweird.f32 %v1383_v13 }
 0x2c4   : > { %vm738_vm13 = vmor %vm736_vm12, %vm737_vm11 }
 0x2c5   : > { %v733_v15 = vsub.f32 1.0, %v732_v14 }
 0x2c7   : > { %v734_v18 = vmul.f32 %v1383_v13, %v733_v15  ;;  %v1365_v15 = vld [vmem:[%s1866_s4] ss:$0 sm:$0xff]  ;;  %s1414_s4 = scalar_lea.hbm %s1849_s14, 64 }
 0x2c8   : > { %1234 = vmatmul.msk.bf16.vlgmr.msrb.gmra.mxu2 %vm518_vm2, %v637_v17 }
 0x2c9   : > { %v735_v20 = vadd.f32 %v1383_v13, %v734_v18 }
 0x2cb   : > { %v739_v22 = vsel %vm738_vm13, %v1383_v13, %v735_v20 }
 0x2cc   : > { %v744_v23 = vsel %vm741_vm14, %v743_v21, %v739_v22  ;;  %v1501_v22 = vmov 32.0  }
 0x2cd   : > { %v745_v24 = vmul.f32 %v1673_v43, %v744_v23 }
 0x2cf   : > { %1238 = vst.msk [vmem:[%s1682_s18 + $0x10] sm:$0xff] %vm518_vm2, %v745_v24  ;;  %v748_v49 = vpack.c.bf16 %v745_v24, %v745_v24 }
 0x33b   : > { %v582_v27 = vpop.f32.mrf.mxu2 }
 0x33c   : > { %v586_v28 = vpack.c.bf16 %v582_v27, %v582_v27 }
 0x33e   : > { %1236 = vmatmul.msk.bf16.vlgmr.msra.gmra.mxu1 %vm518_vm2, %v586_v28 }
 0x343   : > { %v584_v29 = vpop.f32.mrf.mxu2 }
 0x34b   : > { %v655_v30 = vpop.f32.mrf.mxu2 }
 0x34c   : > { %v659_v31 = vpack.c.bf16 %v655_v30, %v655_v30 }
 0x34e   : > { %1235 = vmatmul.msk.bf16.vlgmr.msrb.gmra.mxu0 %vm518_vm2, %v659_v31  ;;  %1241 = vmatmul.msk.bf16.vlgmr.msrb.gmra.mxu1 %vm518_vm2, %v793_v32 }
 0x353   : > { %v657_v33 = vpop.f32.mrf.mxu2 }
 0x354   : > { %v1296_v33 = vld [vmem:[%s1842_s7 + $0x8] sm:$0xff] }
 0x355   : > { %960 = vmatpush.bf16.msrb.mxu0 %v1296_v33 }
 0x3bb   : > { %v695_v34 = vpop.f32.mrf.mxu1 }
 0x3c3   : > { %v697_v35 = vpop.f32.mrf.mxu1 }
 0x3c4   : > { %v1304_v35 = vld [vmem:[%s1844_s9 + $0x38] sm:$0xff] }
 0x3c5   : > { %1037 = vmatpush.bf16.msra.mxu1 %v1304_v35 }
 0x3cb   : > { %v676_v36 = vpop.f32.mrf.mxu0  ;;  %v811_v37 = vpop.f32.mrf.mxu1 }
 0x3cc   : > { %v696_v38 = vadd.f32 %v695_v34, %v676_v36  ;;  %v815_v39 = vsel %vm518_vm2, %v811_v37, -inf  ;;  %v1295_v34 = vld [vmem:[%s1842_s7] sm:$0xff] }
 0x3cd   : > { %816 = vmax.xlane.f32.xlu1 %v815_v39  ;;  %961 = vmatpush.bf16.msrb.mxu0 %v1295_v34 }
 0x3d3   : > { %v678_v40 = vpop.f32.mrf.mxu0  ;;  %v813_v41 = vpop.f32.mrf.mxu1 }
 0x3d4   : > { %v1302_v40 = vld [vmem:[%s1844_s9 + $0x28] sm:$0xff]  ;;  %v1301_v41 = vld [vmem:[%s1844_s9 + $0x20] sm:$0xff] }
 0x3e6   : > { %749 = vrot.lane.b32.xlu1 %v1646_v7, %s1499_s25  ;;  %s1115_s25 = scalar_lea.hbm %s1849_s14, %s1305_s20 }
 0x3e7   : > { %s1118_s27 = sshll.u32 %s1115_s25, 4  ;;  %s1119_s27 = int_to_ptr.hbm [resolvable:$true] %s1118_s27 }
 0x3e8   : > { %s1408_s28 = sshra.s32 %s1119_s27, 4  ;;  %s1409_s28 = int_to_ptr.hbm [resolvable:$true] %s1408_s28 }
 0x3e9   : > { %s1410_s1 = scalar_lea.hbm %s1409_s28, 32  ;;  %p1415_p0 = scmp.lt.s32.totalorder %s1409_s28, %s1849_s14 }
 0x3ea   : > { %p1411_p11 = scmp.ne.s32.totalorder %s1409_s28, %s1410_s1  ;;  %p1416_p1 = scmp.lt.s32.totalorder %s1414_s4, %s1410_s1 }
 0x3ec   : > { %p1412_p12 = pnand %p1411_p11, %p1617_p5  ;;  %p1417_p2 = por %p1416_p1, %p1415_p0 }
 0x3ee   : > { %p1413_p13 = pneg %p1412_p12 }
 0x3f0   : > { %p1418_p3 = pnand %p1417_p2, %p1413_p13 }
 0x440   : > { %v817_v42 = vpop.xlane.xlu1 %816 }
 0x441   : > { %v818_v43 = vsub.f32 %v811_v37, %v817_v42 }
 0x443   : > { %v819_v44 = vmul.f32 1.442695, %v818_v43 }
 0x445   : > { %1384 = vpow2.f32 %v819_v44  ;;  %v1300_v44 = vld [vmem:[%s1844_s9 + $0x18] sm:$0xff] }
 0x44b   : > { %v1385_v45 = vpop.eup %1384 }
 0x44c   : > { %v821_v46 = vsel %vm518_vm2, %v1385_v45, 0.0 }
 0x44d   : > { %822 = vadd.xlane.f32.xlu0 %v821_v46 }
 0x458   : > { %v750_v47 = vpop.permute.xlu1 %749 }
 0x459   : > { %v755_v48 = vsel %vm569_vm1, %v750_v47, 0  ;;  %v1299_v47 = vld [vmem:[%s1844_s9 + $0x10] sm:$0xff] }
 0x45a   : > { %764 = vmatpush.bf16.msra.mxu2 %v755_v48 }
 0x45d   : > { %1239 = vmatmul.msk.bf16.vlgmr.msra.gmra.mxu2 %vm518_vm2, %v748_v49 }
 0x45e   : > { %878 = vmatpush.bf16.msrb.mxu2 %v869_v8 }
 0x461   : > { %842 = vrot.lane.b32.xlu0 %v1646_v7, %s1500_s26  ;;  %s1116_s26 = sshll.u32 %s1682_s18, 4  ;;  %s1117_s26 = int_to_ptr.vmem [resolvable:$true] %s1116_s26 }
 0x4c0   : > { %v823_v51 = vpop.xlane.xlu0 %822 }
 0x4c1   : > { %1386 = vrcp.f32 %v823_v51  ;;  %v835_v56 = vand.u32 2147483648, %v823_v51  ;;  %v833_v58 = vand.u32 2147483647, %v823_v51  ;;  %vm829_vm3 = vweird.f32 %v823_v51 }
 0x4c2   : > { %1388 = vrcp.f32 %v1501_v22 }
 0x4c3   : > { %v836_v7 = vor.u32 1.1754944e-38, %v835_v56  ;;  %vm834_vm5 = vcmp.eq.f32.partialorder %v833_v58, 8.507059e+37  ;;  %v1297_v58 = vld [vmem:[%s1844_s9] sm:$0xff] }
 0x4c7   : > { %v1387_v53 = vpop.eup %1386 }
 0x4c8   : > { %v825_v54 = vmul.f32 %v1387_v53, %v823_v51  ;;  %vm830_vm15 = vweird.f32 %v1387_v53  ;;  %v1389_v23 = vpop.eup %1388 }
 0x4c9   : > { %vm831_vm4 = vmor %vm829_vm3, %vm830_vm15  ;;  %v895_v24 = vmul.f32 32.0, %v1389_v23 }
 0x4ca   : > { %v826_v55 = vsub.f32 1.0, %v825_v54 }
 0x4cb   : > { %v896_v25 = vsub.f32 1.0, %v895_v24 }
 0x4cc   : > { %v827_v57 = vmul.f32 %v1387_v53, %v826_v55 }
 0x4cd   : > { %v897_v26 = vmul.f32 %v1389_v23, %v896_v25 }
 0x4ce   : > { %v828_v59 = vadd.f32 %v1387_v53, %v827_v57  ;;  %v1298_v57 = vld [vmem:[%s1844_s9 + $0x8] sm:$0xff] }
 0x4cf   : > { %v898_v27 = vadd.f32 %v1389_v23, %v897_v26 }
 0x4d0   : > { %v832_v60 = vsel %vm831_vm4, %v1387_v53, %v828_v59  ;;  %v1368_v59 = vld [vmem:[%s1843_s8] ss:$0 sm:$0xff] }
 0x4d1   : > { %v837_v61 = vsel %vm834_vm5, %v836_v7, %v832_v60 }
 0x4d2   : > { %v838_v62 = vmul.f32 %v1385_v45, %v837_v61 }
 0x4d3   : > { %v843_v63 = vpop.permute.xlu0 %842 }
 0x4d4   : > { %v848_v0 = vsel %vm569_vm1, %v843_v63, 0  ;;  %1242 = vst.msk [vmem:[%s1682_s18 + $0x18] sm:$0xff] %vm518_vm2, %v838_v62  ;;  %v841_v1 = vpack.c.bf16 %v838_v62, %v838_v62  ;;  %vm899_vm1 = vweird.f32 %v1389_v23 }
 0x4d5   : > { %857 = vmatpush.bf16.msrb.mxu3 %v848_v0  ;;  %v1727_v28 = vsel %vm899_vm1, %v1389_v23, %v898_v27  ;;  %v1369_v0 = vld [vmem:[%s1845_s10] ss:$0 sm:$0xff] }
 0x4d8   : > { %1243 = vmatmul.msk.bf16.vlgmr.msrb.gmra.mxu3 %vm518_vm2, %v841_v1 }
 0x4e0   : > { %v766_v3 = vpop.f32.mrf.mxu2 }
 0x4e1   : > { %v770_v4 = vpack.c.bf16 %v766_v3, %v766_v3 }
 0x4e3   : > { %1240 = vmatmul.msk.bf16.vlgmr.msra.gmra.mxu0 %vm518_vm2, %v770_v4 }
 0x4e8   : > { %v768_v5 = vpop.f32.mrf.mxu2 }
 0x55b   : > { %v859_v9 = vpop.f32.mrf.mxu3 }
 0x55c   : > { %v863_v10 = vpack.c.bf16 %v859_v9, %v859_v9 }
 0x55e   : > { %1244 = vmatmul.msk.bf16.vlgmr.msrb.gmra.mxu2 %vm518_vm2, %v863_v10 }
 0x560   : > { %v787_v11 = vpop.f32.mrf.mxu0 }
 0x561   : > { %v791_v12 = vadd.f32 %v787_v11, %v696_v38  ;;  %v1303_v38 = vld [vmem:[%s1844_s9 + $0x30] sm:$0xff] }
 0x562   : > { %1038 = vmatpush.bf16.msra.mxu1 %v1303_v38 }
 0x563   : > { %v861_v13 = vpop.f32.mrf.mxu3 }
 0x566   : > { %1039 = vmatpush.bf16.msra.mxu1 %v1302_v40 }
 0x568   : > { %v789_v14 = vpop.f32.mrf.mxu0 }
 0x56a   : > { %1040 = vmatpush.bf16.msra.mxu1 %v1301_v41 }
 0x56e   : > { %1041 = vmatpush.bf16.msra.mxu1 %v1300_v44 }
 0x572   : > { %1042 = vmatpush.bf16.msra.mxu1 %v1299_v47 }
 0x576   : > { %1043 = vmatpush.bf16.msra.mxu1 %v1298_v57 }
 0x57a   : > { %1044 = vmatpush.bf16.msra.mxu1 %v1297_v58 }
 0x5e1   : > { %v880_v16 = vpop.f32.mrf.mxu2 }
 0x5e2   : > { %v884_v17 = vadd.f32 %v880_v16, %v791_v12 }
 0x5e4   : > { %v889_v18 = vadd.f32 %v1365_v15, %v884_v17 }
 0x5e6   : > { %v890_v19 = vadd.f32 %v889_v18, %v1638_v2 }
 0x5e8   : > { %v891_v20 = vsel %vm497_vm0, %v890_v19, 0.0 }
 0x5e9   : > { %892 = vadd.xlane.f32.xlu0 %v891_v20  ;;  %v882_v21 = vpop.f32.mrf.mxu2 }
 0x65c   : > { %v893_v29 = vpop.xlane.xlu0 %892 }
 0x65d   : > { %v901_v30 = vmul.f32 %v1727_v28, %v893_v29 }
 0x65f   : > { %v902_v31 = vsub.f32 %v890_v19, %v901_v30 }
 0x661   : > { %v903_v32 = vmul.f32 %v902_v31, %v902_v31 }
 0x663   : > { %v904_v2 = vsel %vm497_vm0, %v903_v32, 0.0 }
 0x664   : > { %905 = vadd.xlane.f32.xlu2 %v904_v2 }
 0x6d7   : > { %v906_v36 = vpop.xlane.xlu2 %905 }
 0x6d8   : > { %v907_v37 = vmul.f32 %v906_v36, %v1727_v28 }
 0x6da   : > { %v908_v39 = vadd.f32 1e-05, %v907_v37 }
 0x6dc   : > { %1390 = vrsqrt.f32 %v908_v39  ;;  %vm915_vm6 = vweird.f32 %v908_v39 }
 0x6e2   : > { %v1391_v42 = vpop.eup %1390 }
 0x6e3   : > { %v910_v43 = vmul.f32 %v1391_v42, %v908_v39  ;;  %vm916_vm2 = vweird.f32 %v1391_v42 }
 0x6e4   : > { %vm917_vm7 = vmor %vm915_vm6, %vm916_vm2 }
 0x6e5   : > { %v911_v45 = vmul.f32 %v1391_v42, %v910_v43 }
 0x6e7   : > { %v912_v46 = vmul.f32 0.5, %v911_v45 }
 0x6e9   : > { %v913_v48 = vsub.f32 1.5, %v912_v46 }
 0x6eb   : > { %v914_v49 = vmul.f32 %v1391_v42, %v913_v48 }
 0x6ed   : > { %v918_v51 = vsel %vm917_vm7, %v1391_v42, %v914_v49 }
 0x6ee   : > { %v919_v53 = vmul.f32 %v918_v51, %v902_v31 }
 0x6f0   : > { %v924_v54 = vmul.f32 %v1366_v50, %v919_v53 }
 0x6f2   : > { %v929_v55 = vadd.f32 %v1367_v52, %v924_v54 }
 0x6f4   : > { %v930_v56 = vpack.c.bf16 %v929_v55, %v929_v55 }
 0x6f6   : > { %1253 = vmatmul.msk.bf16.vlgmr.msrb.gmra.mxu0 %vm497_vm0, %v930_v56 }
 0x773   : > { %v963_v7 = vpop.f32.mrf.mxu0 }
 0x774   : > { %v964_v60 = vadd.f32 %v1368_v59, %v963_v7 }
 0x776   : > { %v967_v61 = vmax.f32 %v964_v60, 0.0 }
 0x778   : > { %v968_v62 = vpack.c.bf16 %v967_v61, %v967_v61 }
 0x77a   : > { %1045 = vmatmul.bf16.vlgmr.msra.gmra.mxu1 %v968_v62 }
 0x77b   : > { %v965_v63 = vpop.f32.mrf.mxu0 }
 0x7f7   : > { %v1046_v1 = vpop.f32.mrf.mxu1 }
 0x7f8   : > { %v1047_v3 = vadd.f32 %v1369_v0, %v1046_v1 }
 0x7fa   : > { %v1050_v4 = vadd.f32 %v1047_v3, %v929_v55 }
 0x7fc   : > { %v1051_v5 = vsel %vm497_vm0, %v1050_v4, 0.0 }
 0x7fd   : > { %1052 = vadd.xlane.f32.xlu1 %v1051_v5 }
 0x7ff   : > { %v1048_v6 = vpop.f32.mrf.mxu1 }
 0x870   : > { %v1053_v8 = vpop.xlane.xlu1 %1052 }
 0x871   : > { %v1054_v9 = vmul.f32 %v1053_v8, %v1727_v28 }
 0x873   : > { %v1055_v10 = vsub.f32 %v1050_v4, %v1054_v9 }
 0x875   : > { %v1056_v11 = vmul.f32 %v1055_v10, %v1055_v10 }
 0x877   : > { %v1057_v12 = vsel %vm497_vm0, %v1056_v11, 0.0 }
 0x878   : > { %1058 = vadd.xlane.f32.xlu0 %v1057_v12 }
 0x879   : > { %1421 = shalt.err (!%p1418_p3)
}
 0x87a   : > { %s1502_s18 = smov 128   ;;  %s1503_s20 = smov 8   ;;  %v1370_v22 = vld [vmem:[%s1846_s11] ss:$0 sm:$0xff] }
 0x87b   : > { %1307 = dma.vmem_to_hbm [thread:$0]  (%p1617_p5), %s1117_s26, 512, %s1119_s27, %s1090_s22, %s1502_s18, %s1502_s18, %s1503_s20  }
 0x87c   : > { %s1218_s1 = sshll.u32 %s1679_s15, 3  ;;  %s1288_s2 = sshll.u32 %s1600_s17, 3  ;;  %v1371_v25 = vld [vmem:[%s1847_s12] ss:$0 sm:$0xff] }
 0x87d   : > { %s1100_s21 = scalar_lea.hbm %s1848_s13, %s1288_s2  ;;  %s462_s17 = scalar_lea.vmem [#allocation2], %s1218_s1 }
 0x87e   : > { %s1102_s26 = sshll.u32 %s462_s17, 4  ;;  %s1104_s27 = sshll.u32 %s1100_s21, 4  ;;  %s1103_s26 = int_to_ptr.vmem [resolvable:$true] %s1102_s26  ;;  %s1105_s27 = int_to_ptr.hbm [resolvable:$true] %s1104_s27 }
 0x87f   : > { %s1085_s22 = scalar_lea.sflag [#allocation3], %s1679_s15  ;;  %s1436_s28 = sshra.s32 %s1105_s27, 4  ;;  %s1437_s28 = int_to_ptr.hbm [resolvable:$true] %s1436_s28 }
 0x880   : > { %s1438_s18 = scalar_lea.hbm %s1437_s28, 8  ;;  %s1442_s1 = scalar_lea.hbm %s1848_s13, 16 }
 0x881   : > { %p1439_p4 = scmp.ne.s32.totalorder %s1437_s28, %s1438_s18  ;;  %p1443_p9 = scmp.lt.s32.totalorder %s1437_s28, %s1848_s13 }
 0x882   : > { %p1444_p10 = scmp.lt.s32.totalorder %s1442_s1, %s1438_s18 }
 0x883   : > { %p1440_p7 = pnand %p1439_p4, %p1617_p5 }
 0x884   : > { %p1445_p11 = por %p1444_p10, %p1443_p9 }
 0x885   : > { %p1441_p8 = pneg %p1440_p7 }
 0x887   : > { %p1446_p12 = pnand %p1445_p11, %p1441_p8 }
 0x8eb   : > { %v1059_v13 = vpop.xlane.xlu0 %1058 }
 0x8ec   : > { %v1060_v14 = vmul.f32 %v1059_v13, %v1727_v28 }
 0x8ee   : > { %v1061_v15 = vadd.f32 1e-05, %v1060_v14 }
 0x8f0   : > { %1392 = vrsqrt.f32 %v1061_v15  ;;  %vm1068_vm9 = vweird.f32 %v1061_v15 }
 0x8f6   : > { %v1393_v16 = vpop.eup %1392 }
 0x8f7   : > { %v1063_v17 = vmul.f32 %v1393_v16, %v1061_v15  ;;  %vm1069_vm8 = vweird.f32 %v1393_v16 }
 0x8f8   : > { %vm1070_vm10 = vmor %vm1068_vm9, %vm1069_vm8 }
 0x8f9   : > { %v1064_v18 = vmul.f32 %v1393_v16, %v1063_v17 }
 0x8fb   : > { %v1065_v19 = vmul.f32 0.5, %v1064_v18 }
 0x8fd   : > { %v1066_v20 = vsub.f32 1.5, %v1065_v19 }
 0x8ff   : > { %v1067_v21 = vmul.f32 %v1393_v16, %v1066_v20 }
 0x901   : > { %v1071_v23 = vsel %vm1070_vm10, %v1393_v16, %v1067_v21 }
 0x902   : > { %v1072_v24 = vmul.f32 %v1071_v23, %v1055_v10 }
 0x904   : > { %v1077_v26 = vmul.f32 %v1370_v22, %v1072_v24 }
 0x906   : > { %v1082_v27 = vadd.f32 %v1371_v25, %v1077_v26 }
 0x908   : > { %1083 = vst.msk [vmem:[%s462_s17] sm:$0xff] %vm497_vm0, %v1082_v27 }
 0x909   : > { %1449 = shalt.err (!%p1446_p12)
}
 0x90a   : > { %1306 = dma.vmem_to_hbm [thread:$0]  (%p1617_p5), %s1103_s26, 128, %s1105_s27, %s1085_s22  }
 0x90b PF: > { %p1317_p13 = scmp.ge.s32.totalorder %s1488_s16, 2  ;;  %s1133_s15 = sand.u32 1, %s1476_s29  }
 0x90c   : > { %s1134_s5 = scalar_lea.sflag [#allocation3], %s1133_s15 }
 0x90d   : > { %p1311_p0 = pnand %p1317_p13, %p1621_p6 }
 0x90f   : > { %p1312_p1 = pneg %p1311_p0 }
 0x911   : > { %1467 = dma.done.wait (%p1312_p1), %s1134_s5, 128  }
 0x912   : > { %1469 = vsyncadd (%p1312_p1), %s1134_s5, 4294967168  ;;  %s1144_s6 = scalar_lea.sflag [#allocation5], %s1133_s15 }
 0x913   : > { %1471 = dma.done.wait (%p1312_p1), %s1144_s6, 512  }
 0x914   : > { %1473 = vsyncadd (%p1312_p1), %s1144_s6, 4294966784  ;;  %s1869_s21 = sld [smem:[#allocation8_spill]]  ;;  %p28_p5 = scmp.ge.s32.totalorder %s1604_s19, 4  }
 0x915   : > { %s1870_s15 = sld [smem:[#allocation9_spill]]  ;;  %s1871_s29 = smov %s1480_s30 }
 0x916   : > { %s1873_s16 = smov %s1604_s19  ;;  %30 = sbr.rel (!%p28_p5) target bundleno = 13 (0xd), region = 127 }
 0x91a   : > { %s1872_s30 = smov %s1869_s21 }
 0x91b   :  { %1150 = vsyncpa [#allocation3], 1 }
 0x91c   :  { %1152 = vsyncpa [#allocation3 + $0x1], 1 }
 0x91d   :  { %1153 = vsyncpa [#allocation5], 1 }
 0x91e   :  { %1155 = vsyncpa [#allocation5 + $0x1], 1 }

</bundles_post_ra>
